<compile_context>
chip_gen: v6e
topology: v6e:2x2x1
jax: 0.10.0
libtpu: 0.0.40
codegen_flags: <defaults>
</compile_context>

<pallas_src>
import functools

import jax
import jax.numpy as jnp
from jax import lax
from jax.experimental import pallas as pl
from jax.experimental.pallas import tpu as pltpu

KERNEL_SIZE = 7


# ----------------------------------- fused kernel ------------------------------------
def _encoder_kernel(*refs, alpha, ks, n_layers):
    (x_ref, cw_ref, cb_ref,
     wf1_ref, wf2_ref, lbf_ref, af_ref, bf_ref,
     wt1_ref, wt2_ref, lbt_ref, at_ref, bt_ref) = refs[:13]
    n_in = 13 + 4 * n_layers
    gru_refs = refs[13:n_in]
    out_ref = refs[n_in]
    xp_ref, xu_ref, comb_ref, seq_ref = refs[n_in + 1:]

    T = x_ref.shape[1]
    C = x_ref.shape[2]
    H = out_ref.shape[2]
    pad = (ks - 1) // 2

    # ------------------- Conv1d("same") + ReLU as one im2col matmul -------------------
    xp_ref[...] = jnp.zeros_like(xp_ref)            # zero-pad in VMEM (no wrapper jnp.pad)
    xp_ref[pad:pad + T, :] = x_ref[0]
    for k in range(ks):                             # static unroll: build (T, ks*C) unfold
        xu_ref[:, k * C:(k + 1) * C] = xp_ref[k:k + T, :]
    conv = jnp.maximum(
        jnp.dot(xu_ref[...], cw_ref[...], preferred_element_type=jnp.float32)
        + cb_ref[...], 0.0)                         # (T, C)

    # ----------------------- GATv2 attention weights (shared) -------------------------
    def gat_scores(v, w1, w2, lb, a, bias):
        # v: (K, D); w1/w2: (D, E); lb/a: (1, E); bias: (K, K)  ->  softmax attn (K, K)
        p = jnp.dot(v, w1, preferred_element_type=jnp.float32)       # W * v_i part
        q = jnp.dot(v, w2, preferred_element_type=jnp.float32)       # W * v_j part
        z = p[:, None, :] + q[None, :, :] + lb[:, None, :]           # (K, K, E)
        z = jnp.where(z > 0.0, z, alpha * z)                         # LeakyReLU
        e = jnp.sum(z * a[:, None, :], axis=-1) + bias               # (K, K)
        e = e - jnp.max(e, axis=-1, keepdims=True)                   # softmax over last dim
        ew = jnp.exp(e)
        return ew / jnp.sum(ew, axis=-1, keepdims=True)

    # Feature attention: nodes = features (K=C), node vector = time window (D=T).
    attn_f = gat_scores(conv.T, wf1_ref[...], wf2_ref[...],
                        lbf_ref[...], af_ref[...], bf_ref[...])      # (C, C)
    # feat_att[t, i] = sigmoid(sum_j attn_f[i, j] * conv[t, j])  == (attn_f @ conv.T).T
    feat_att = jax.nn.sigmoid(
        lax.dot_general(conv, attn_f, (((1,), (1,)), ((), ())),
                        preferred_element_type=jnp.float32))          # (T, C)

    # Temporal attention: nodes = timesteps (K=T), node vector = features (D=C).
    attn_t = gat_scores(conv, wt1_ref[...], wt2_ref[...],
                        lbt_ref[...], at_ref[...], bt_ref[...])      # (T, T)
    temp_att = jax.nn.sigmoid(
        jnp.dot(attn_t, conv, preferred_element_type=jnp.float32))    # (T, C)
    # TODO(synk): torch.dropout on attention weights is train-time stochastic; eval-mode
    # identity here.

    # ------------------------------- concat in VMEM -----------------------------------
    comb_ref[:, 0:C] = conv
    comb_ref[:, C:2 * C] = feat_att
    comb_ref[:, 2 * C:3 * C] = temp_att

    # -------------------------------- stacked GRU -------------------------------------
    layer_in = comb_ref[...]                        # (T, I0) with I0 = 3C
    for l in range(n_layers):
        wih = gru_refs[4 * l][...]                  # (I, 3H)  columns packed [r | z | n]
        whh = gru_refs[4 * l + 1][...]              # (H, 3H)
        bih = gru_refs[4 * l + 2][...]              # (1, 3H)
        bhh = gru_refs[4 * l + 3][...]              # (1, 3H)
        # Input projections for ALL timesteps, hoisted out of the serial recurrence.
        gi = jnp.dot(layer_in, wih, preferred_element_type=jnp.float32) + bih   # (T, 3H)
        h = jnp.zeros((1, H), jnp.float32)
        for t in range(T):                          # static unroll (short, fixed T)
            gh = jnp.dot(h, whh, preferred_element_type=jnp.float32) + bhh      # (1, 3H)
            gi_t = gi[t:t + 1, :]
            r = jax.nn.sigmoid(gi_t[:, 0:H] + gh[:, 0:H])
            zg = jax.nn.sigmoid(gi_t[:, H:2 * H] + gh[:, H:2 * H])
            n = jnp.tanh(gi_t[:, 2 * H:3 * H] + r * gh[:, 2 * H:3 * H])
            h = (1.0 - zg) * n + zg * h
            seq_ref[t:t + 1, :] = h
        layer_in = seq_ref[...]

    out_ref[0] = seq_ref[...]
    # note: EncoderBlock.norm / EncoderBlock.dropout are unused in the reference forward.


# ------------------------------------- wrapper ---------------------------------------
def encoder_block_forward(x, params, alpha):
    # x: (B, window, n_features) -> (B, window, gru_hid_dim)
    B, T, C = x.shape
    KS = KERNEL_SIZE
    conv_w, conv_b = params["conv"]
    H = params["gru"][0][1].shape[0]
    n_layers = len(params["gru"])

    def full2d(arr):
        return pl.BlockSpec(arr.shape, lambda b: (0, 0))

    in_specs = [pl.BlockSpec((1, T, C), lambda b: (b, 0, 0)),
                full2d(conv_w), full2d(conv_b)]
    for p_ in params["feat"]:
        in_specs.append(full2d(p_))
    for p_ in params["temp"]:
        in_specs.append(full2d(p_))
    gru_flat = []
    for layer in params["gru"]:
        for p_ in layer:
            in_specs.append(full2d(p_))
            gru_flat.append(p_)

    kern = functools.partial(_encoder_kernel, alpha=alpha, ks=KS, n_layers=n_layers)
    return pl.pallas_call(
        kern,
        out_shape=jax.ShapeDtypeStruct((B, T, H), jnp.float32),
        grid=(B,),
        in_specs=in_specs,
        out_specs=pl.BlockSpec((1, T, H), lambda b: (b, 0, 0)),
        scratch_shapes=[
            pltpu.VMEM((T + KS - 1, C), jnp.float32),   # zero-padded conv input
            pltpu.VMEM((T, KS * C), jnp.float32),       # im2col buffer
            pltpu.VMEM((T, 3 * C), jnp.float32),        # concat(conv, feat_att, temp_att)
            pltpu.VMEM((T, H), jnp.float32),            # per-layer GRU output sequence
        ],
        compiler_params=pltpu.CompilerParams(
            dimension_semantics=("parallel",)),          # batch axis -> megacore split
    )(x, conv_w, conv_b, *params["feat"], *params["temp"], *gru_flat)


# -------------------------------- deterministic params --------------------------------
def _uniform(key, shape, scale):
    return jax.random.uniform(key, shape, jnp.float32, -scale, scale)


def init_params(key, n_features, window_size, gru_hid_dim, n_layers):
    keys = iter(jax.random.split(key, 64))
    KS = KERNEL_SIZE
    C, T, H = n_features, window_size, gru_hid_dim

    s_conv = 1.0 / (C * KS) ** 0.5
    # packed conv weight: row block k equals torch_conv.weight[:, :, k].T  -> (KS*Cin, Cout)
    conv_w = _uniform(next(keys), (KS, C, C), s_conv).reshape(KS * C, C)
    conv_b = _uniform(next(keys), (1, C), s_conv)

    def gat_params(K, D):
        E = 2 * D                                       # GATv2: embed_dim = 2 * node_dim
        s = 1.0 / (2 * D) ** 0.5
        w = _uniform(next(keys), (2 * D, E), s)         # == torch lin.weight.T  (2D, E)
        w1, w2 = w[:D, :], w[D:, :]                     # acts on v_i / v_j halves
        lb = _uniform(next(keys), (1, E), s)            # lin bias
        a = _uniform(next(keys), (1, E), 1.414 * (6.0 / (E + 1)) ** 0.5)   # xavier-like
        bias = jnp.zeros((K, K), jnp.float32)
        return (w1, w2, lb, a, bias)

    feat = gat_params(C, T)                             # K = n_features, D = window
    temp = gat_params(T, C)                             # K = window,     D = n_features

    gru = []
    in_dim = 3 * C
    for _ in range(n_layers):
        s = 1.0 / H ** 0.5
        wih = _uniform(next(keys), (in_dim, 3 * H), s)  # torch weight_ih.T, gates [r|z|n]
        whh = _uniform(next(keys), (H, 3 * H), s)       # torch weight_hh.T
        bih = _uniform(next(keys), (1, 3 * H), s)
        bhh = _uniform(next(keys), (1, 3 * H), s)
        gru.append((wih, whh, bih, bhh))
        in_dim = H

    return {"conv": (conv_w, conv_b), "feat": feat, "temp": temp, "gru": gru}


if __name__ == "__main__":
    B, WINDOW, N_FEATURES = 2, 8, 4
    GRU_HID, N_LAYERS, ALPHA = 16, 1, 0.2

    key = jax.random.PRNGKey(0)
    params = init_params(key, N_FEATURES, WINDOW, GRU_HID, N_LAYERS)
    x = jax.random.normal(jax.random.fold_in(key, 999), (B, WINDOW, N_FEATURES), jnp.float32)

    out = encoder_block_forward(x, params, ALPHA)
    out = jax.block_until_ready(out)

    assert out.shape == (B, WINDOW, GRU_HID), out.shape
    assert bool(jnp.all(jnp.isfinite(out)))
    print("KERNEL_OK")
</pallas_src>

<mosaic_0001>
module attributes {stable_mosaic.version = 11 : i64} {
  func.func @_encoder_kernel(%arg0: i32, %arg1: memref<1x8x4xf32, #tpu.memory_space<vmem>>, %arg2: memref<28x4xf32, #tpu.memory_space<vmem>>, %arg3: memref<1x4xf32, #tpu.memory_space<vmem>>, %arg4: memref<8x16xf32, #tpu.memory_space<vmem>>, %arg5: memref<8x16xf32, #tpu.memory_space<vmem>>, %arg6: memref<1x16xf32, #tpu.memory_space<vmem>>, %arg7: memref<1x16xf32, #tpu.memory_space<vmem>>, %arg8: memref<4x4xf32, #tpu.memory_space<vmem>>, %arg9: memref<4x8xf32, #tpu.memory_space<vmem>>, %arg10: memref<4x8xf32, #tpu.memory_space<vmem>>, %arg11: memref<1x8xf32, #tpu.memory_space<vmem>>, %arg12: memref<1x8xf32, #tpu.memory_space<vmem>>, %arg13: memref<8x8xf32, #tpu.memory_space<vmem>>, %arg14: memref<12x48xf32, #tpu.memory_space<vmem>>, %arg15: memref<16x48xf32, #tpu.memory_space<vmem>>, %arg16: memref<1x48xf32, #tpu.memory_space<vmem>>, %arg17: memref<1x48xf32, #tpu.memory_space<vmem>>, %arg18: memref<1x8x16xf32, #tpu.memory_space<vmem>>, %arg19: memref<14x4xf32, #tpu.memory_space<vmem>>, %arg20: memref<8x28xf32, #tpu.memory_space<vmem>>, %arg21: memref<8x12xf32, #tpu.memory_space<vmem>>, %arg22: memref<8x16xf32, #tpu.memory_space<vmem>>) attributes {dimension_semantics = [#tpu.dimension_semantics<parallel>], iteration_bounds = array<i64: 2>, scalar_prefetch = 0 : i64, scratch_operands = 4 : i64, tpu.core_type = #tpu.core_type<tc>, window_params = [{transform_indices = @transform_0, window_bounds = array<i64: 1, 8, 4>}, {pipeline_mode = #tpu.pipeline_mode<synchronous>, transform_indices = @transform_1, window_bounds = array<i64: 28, 4>}, {pipeline_mode = #tpu.pipeline_mode<synchronous>, transform_indices = @transform_2, window_bounds = array<i64: 1, 4>}, {pipeline_mode = #tpu.pipeline_mode<synchronous>, transform_indices = @transform_3, window_bounds = array<i64: 8, 16>}, {pipeline_mode = #tpu.pipeline_mode<synchronous>, transform_indices = @transform_4, window_bounds = array<i64: 8, 16>}, {pipeline_mode = #tpu.pipeline_mode<synchronous>, transform_indices = @transform_5, window_bounds = array<i64: 1, 16>}, {pipeline_mode = #tpu.pipeline_mode<synchronous>, transform_indices = @transform_6, window_bounds = array<i64: 1, 16>}, {pipeline_mode = #tpu.pipeline_mode<synchronous>, transform_indices = @transform_7, window_bounds = array<i64: 4, 4>}, {pipeline_mode = #tpu.pipeline_mode<synchronous>, transform_indices = @transform_8, window_bounds = array<i64: 4, 8>}, {pipeline_mode = #tpu.pipeline_mode<synchronous>, transform_indices = @transform_9, window_bounds = array<i64: 4, 8>}, {pipeline_mode = #tpu.pipeline_mode<synchronous>, transform_indices = @transform_10, window_bounds = array<i64: 1, 8>}, {pipeline_mode = #tpu.pipeline_mode<synchronous>, transform_indices = @transform_11, window_bounds = array<i64: 1, 8>}, {pipeline_mode = #tpu.pipeline_mode<synchronous>, transform_indices = @transform_12, window_bounds = array<i64: 8, 8>}, {pipeline_mode = #tpu.pipeline_mode<synchronous>, transform_indices = @transform_13, window_bounds = array<i64: 12, 48>}, {pipeline_mode = #tpu.pipeline_mode<synchronous>, transform_indices = @transform_14, window_bounds = array<i64: 16, 48>}, {pipeline_mode = #tpu.pipeline_mode<synchronous>, transform_indices = @transform_15, window_bounds = array<i64: 1, 48>}, {pipeline_mode = #tpu.pipeline_mode<synchronous>, transform_indices = @transform_16, window_bounds = array<i64: 1, 48>}, {transform_indices = @transform_17, window_bounds = array<i64: 1, 8, 16>}]} {
    %cst = arith.constant 0.000000e+00 : f32
    %0 = vector.broadcast %cst : f32 to vector<14x4xf32>
    %c0 = arith.constant 0 : index
    %c0_0 = arith.constant 0 : index
    %1 = vector.load %arg19[%c0, %c0_0] : memref<14x4xf32, #tpu.memory_space<vmem>>, vector<14x4xf32>
    tpu.vector_store %arg19[%c0, %c0_0], %0 {strides = array<i32>} : memref<14x4xf32, #tpu.memory_space<vmem>>, vector<14x4xf32>,
    %c0_1 = arith.constant 0 : index
    %c0_2 = arith.constant 0 : index
    %c0_3 = arith.constant 0 : index
    %2 = vector.load %arg1[%c0_1, %c0_2, %c0_3] : memref<1x8x4xf32, #tpu.memory_space<vmem>>, vector<1x8x4xf32>
    %3 = vector.shape_cast %2 : vector<1x8x4xf32> to vector<8x4xf32>
    %c3 = arith.constant 3 : index
    %c0_4 = arith.constant 0 : index
    %4 = vector.load %arg19[%c3, %c0_4] : memref<14x4xf32, #tpu.memory_space<vmem>>, vector<8x4xf32>
    tpu.vector_store %arg19[%c3, %c0_4], %3 {strides = array<i32>} : memref<14x4xf32, #tpu.memory_space<vmem>>, vector<8x4xf32>,
    %c0_5 = arith.constant 0 : index
    %c0_6 = arith.constant 0 : index
    %5 = vector.load %arg19[%c0_5, %c0_6] : memref<14x4xf32, #tpu.memory_space<vmem>>, vector<8x4xf32>
    %c0_7 = arith.constant 0 : index
    %c0_8 = arith.constant 0 : index
    %6 = vector.load %arg20[%c0_7, %c0_8] : memref<8x28xf32, #tpu.memory_space<vmem>>, vector<8x4xf32>
    tpu.vector_store %arg20[%c0_7, %c0_8], %5 {strides = array<i32>} : memref<8x28xf32, #tpu.memory_space<vmem>>, vector<8x4xf32>,
    %c1 = arith.constant 1 : index
    %c0_9 = arith.constant 0 : index
    %7 = vector.load %arg19[%c1, %c0_9] : memref<14x4xf32, #tpu.memory_space<vmem>>, vector<8x4xf32>
    %c0_10 = arith.constant 0 : index
    %c4 = arith.constant 4 : index
    %8 = vector.load %arg20[%c0_10, %c4] : memref<8x28xf32, #tpu.memory_space<vmem>>, vector<8x4xf32>
    tpu.vector_store %arg20[%c0_10, %c4], %7 {strides = array<i32>} : memref<8x28xf32, #tpu.memory_space<vmem>>, vector<8x4xf32>,
    %c2 = arith.constant 2 : index
    %c0_11 = arith.constant 0 : index
    %9 = vector.load %arg19[%c2, %c0_11] : memref<14x4xf32, #tpu.memory_space<vmem>>, vector<8x4xf32>
    %c0_12 = arith.constant 0 : index
    %c8 = arith.constant 8 : index
    %10 = vector.load %arg20[%c0_12, %c8] : memref<8x28xf32, #tpu.memory_space<vmem>>, vector<8x4xf32>
    tpu.vector_store %arg20[%c0_12, %c8], %9 {strides = array<i32>} : memref<8x28xf32, #tpu.memory_space<vmem>>, vector<8x4xf32>,
    %c3_13 = arith.constant 3 : index
    %c0_14 = arith.constant 0 : index
    %11 = vector.load %arg19[%c3_13, %c0_14] : memref<14x4xf32, #tpu.memory_space<vmem>>, vector<8x4xf32>
    %c0_15 = arith.constant 0 : index
    %c12 = arith.constant 12 : index
    %12 = vector.load %arg20[%c0_15, %c12] : memref<8x28xf32, #tpu.memory_space<vmem>>, vector<8x4xf32>
    tpu.vector_store %arg20[%c0_15, %c12], %11 {strides = array<i32>} : memref<8x28xf32, #tpu.memory_space<vmem>>, vector<8x4xf32>,
    %c4_16 = arith.constant 4 : index
    %c0_17 = arith.constant 0 : index
    %13 = vector.load %arg19[%c4_16, %c0_17] : memref<14x4xf32, #tpu.memory_space<vmem>>, vector<8x4xf32>
    %c0_18 = arith.constant 0 : index
    %c16 = arith.constant 16 : index
    %14 = vector.load %arg20[%c0_18, %c16] : memref<8x28xf32, #tpu.memory_space<vmem>>, vector<8x4xf32>
    tpu.vector_store %arg20[%c0_18, %c16], %13 {strides = array<i32>} : memref<8x28xf32, #tpu.memory_space<vmem>>, vector<8x4xf32>,
    %c5 = arith.constant 5 : index
    %c0_19 = arith.constant 0 : index
    %15 = vector.load %arg19[%c5, %c0_19] : memref<14x4xf32, #tpu.memory_space<vmem>>, vector<8x4xf32>
    %c0_20 = arith.constant 0 : index
    %c20 = arith.constant 20 : index
    %16 = vector.load %arg20[%c0_20, %c20] : memref<8x28xf32, #tpu.memory_space<vmem>>, vector<8x4xf32>
    tpu.vector_store %arg20[%c0_20, %c20], %15 {strides = array<i32>} : memref<8x28xf32, #tpu.memory_space<vmem>>, vector<8x4xf32>,
    %c6 = arith.constant 6 : index
    %c0_21 = arith.constant 0 : index
    %17 = vector.load %arg19[%c6, %c0_21] : memref<14x4xf32, #tpu.memory_space<vmem>>, vector<8x4xf32>
    %c0_22 = arith.constant 0 : index
    %c24 = arith.constant 24 : index
    %18 = vector.load %arg20[%c0_22, %c24] : memref<8x28xf32, #tpu.memory_space<vmem>>, vector<8x4xf32>
    tpu.vector_store %arg20[%c0_22, %c24], %17 {strides = array<i32>} : memref<8x28xf32, #tpu.memory_space<vmem>>, vector<8x4xf32>,
    %c0_23 = arith.constant 0 : index
    %c0_24 = arith.constant 0 : index
    %19 = vector.load %arg20[%c0_23, %c0_24] : memref<8x28xf32, #tpu.memory_space<vmem>>, vector<8x28xf32>
    %c0_25 = arith.constant 0 : index
    %c0_26 = arith.constant 0 : index
    %20 = vector.load %arg2[%c0_25, %c0_26] : memref<28x4xf32, #tpu.memory_space<vmem>>, vector<28x4xf32>
    %cst_27 = arith.constant dense<0.000000e+00> : vector<8x4xf32>
    %21 = tpu.matmul %19, %20, %cst_27 {dimension_numbers = #tpu.dot_dimension_numbers<[1], [0], [0], [1], [0, 0, 1, 1], [], []>} : vector<8x28xf32>, vector<28x4xf32>, vector<8x4xf32> -> vector<8x4xf32>
    %c0_28 = arith.constant 0 : index
    %c0_29 = arith.constant 0 : index
    %22 = vector.load %arg3[%c0_28, %c0_29] : memref<1x4xf32, #tpu.memory_space<vmem>>, vector<1x4xf32>
    %23 = vector.broadcast %22 : vector<1x4xf32> to vector<8x4xf32>
    %24 = arith.addf %21, %23 : vector<8x4xf32>
    %cst_30 = arith.constant 0.000000e+00 : f32
    %25 = vector.broadcast %cst_30 : f32 to vector<8x4xf32>
    %26 = arith.maximumf %24, %25 : vector<8x4xf32>
    %27 = tpu.transpose %26, [1, 0] : vector<8x4xf32> -> vector<4x8xf32>
    %c0_31 = arith.constant 0 : index
    %c0_32 = arith.constant 0 : index
    %28 = vector.load %arg4[%c0_31, %c0_32] : memref<8x16xf32, #tpu.memory_space<vmem>>, vector<8x16xf32>
    %c0_33 = arith.constant 0 : index
    %c0_34 = arith.constant 0 : index
    %29 = vector.load %arg5[%c0_33, %c0_34] : memref<8x16xf32, #tpu.memory_space<vmem>>, vector<8x16xf32>
    %c0_35 = arith.constant 0 : index
    %c0_36 = arith.constant 0 : index
    %30 = vector.load %arg6[%c0_35, %c0_36] : memref<1x16xf32, #tpu.memory_space<vmem>>, vector<1x16xf32>
    %c0_37 = arith.constant 0 : index
    %c0_38 = arith.constant 0 : index
    %31 = vector.load %arg7[%c0_37, %c0_38] : memref<1x16xf32, #tpu.memory_space<vmem>>, vector<1x16xf32>
    %c0_39 = arith.constant 0 : index
    %c0_40 = arith.constant 0 : index
    %32 = vector.load %arg8[%c0_39, %c0_40] : memref<4x4xf32, #tpu.memory_space<vmem>>, vector<4x4xf32>
    %cst_41 = arith.constant dense<0.000000e+00> : vector<4x16xf32>
    %33 = tpu.matmul %27, %28, %cst_41 {dimension_numbers = #tpu.dot_dimension_numbers<[1], [0], [0], [1], [0, 0, 1, 1], [], []>} : vector<4x8xf32>, vector<8x16xf32>, vector<4x16xf32> -> vector<4x16xf32>
    %cst_42 = arith.constant dense<0.000000e+00> : vector<4x16xf32>
    %34 = tpu.matmul %27, %29, %cst_42 {dimension_numbers = #tpu.dot_dimension_numbers<[1], [0], [0], [1], [0, 0, 1, 1], [], []>} : vector<4x8xf32>, vector<8x16xf32>, vector<4x16xf32> -> vector<4x16xf32>
    %35 = vector.shape_cast %33 : vector<4x16xf32> to vector<4x1x16xf32>
    %36 = vector.shape_cast %34 : vector<4x16xf32> to vector<1x4x16xf32>
    %37 = vector.broadcast %35 : vector<4x1x16xf32> to vector<4x4x16xf32>
    %38 = vector.broadcast %36 : vector<1x4x16xf32> to vector<4x4x16xf32>
    %39 = arith.addf %37, %38 : vector<4x4x16xf32>
    %40 = vector.shape_cast %30 : vector<1x16xf32> to vector<1x1x16xf32>
    %41 = vector.broadcast %40 : vector<1x1x16xf32> to vector<4x4x16xf32>
    %42 = arith.addf %39, %41 : vector<4x4x16xf32>
    %cst_43 = arith.constant 0.000000e+00 : f32
    %43 = vector.broadcast %cst_43 : f32 to vector<4x4x16xf32>
    %44 = arith.cmpf ogt, %42, %43 : vector<4x4x16xf32>
    %cst_44 = arith.constant 2.000000e-01 : f32
    %45 = vector.broadcast %cst_44 : f32 to vector<4x4x16xf32>
    %46 = arith.mulf %45, %42 : vector<4x4x16xf32>
    %47 = arith.select %44, %42, %46 : vector<4x4x16xi1>, vector<4x4x16xf32>
    %48 = vector.shape_cast %31 : vector<1x16xf32> to vector<1x1x16xf32>
    %49 = vector.broadcast %48 : vector<1x1x16xf32> to vector<4x4x16xf32>
    %50 = arith.mulf %47, %49 : vector<4x4x16xf32>
    %cst_45 = arith.constant dense<0.000000e+00> : vector<4x4xf32>
    %51 = vector.multi_reduction <add>, %50, %cst_45 [2] : vector<4x4x16xf32> to vector<4x4xf32>
    %52 = arith.addf %51, %32 : vector<4x4xf32>
    %cst_46 = arith.constant dense<0xFF800000> : vector<4xf32>
    %53 = vector.multi_reduction <maximumf>, %52, %cst_46 [1] : vector<4x4xf32> to vector<4xf32>
    %54 = vector.shape_cast %53 : vector<4xf32> to vector<4x1xf32>
    %55 = vector.broadcast %54 : vector<4x1xf32> to vector<4x4xf32>
    %56 = arith.subf %52, %55 : vector<4x4xf32>
    %57 = math.exp %56 : vector<4x4xf32>
    %cst_47 = arith.constant dense<0.000000e+00> : vector<4xf32>
    %58 = vector.multi_reduction <add>, %57, %cst_47 [1] : vector<4x4xf32> to vector<4xf32>
    %59 = vector.shape_cast %58 : vector<4xf32> to vector<4x1xf32>
    %60 = vector.broadcast %59 : vector<4x1xf32> to vector<4x4xf32>
    %61 = arith.divf %57, %60 : vector<4x4xf32>
    %cst_48 = arith.constant dense<0.000000e+00> : vector<8x4xf32>
    %62 = tpu.matmul %26, %61, %cst_48 {dimension_numbers = #tpu.dot_dimension_numbers<[1], [1], [0], [0], [0, 0, 1, 0], [], []>} : vector<8x4xf32>, vector<4x4xf32>, vector<8x4xf32> -> vector<8x4xf32>
    %63 = arith.negf %62 : vector<8x4xf32>
    %64 = math.exp %63 : vector<8x4xf32>
    %cst_49 = arith.constant 1.000000e+00 : f32
    %65 = vector.broadcast %cst_49 : f32 to vector<8x4xf32>
    %66 = arith.addf %65, %64 : vector<8x4xf32>
    %67 = arith.divf %65, %66 : vector<8x4xf32>
    %c0_50 = arith.constant 0 : index
    %c0_51 = arith.constant 0 : index
    %68 = vector.load %arg9[%c0_50, %c0_51] : memref<4x8xf32, #tpu.memory_space<vmem>>, vector<4x8xf32>
    %c0_52 = arith.constant 0 : index
    %c0_53 = arith.constant 0 : index
    %69 = vector.load %arg10[%c0_52, %c0_53] : memref<4x8xf32, #tpu.memory_space<vmem>>, vector<4x8xf32>
    %c0_54 = arith.constant 0 : index
    %c0_55 = arith.constant 0 : index
    %70 = vector.load %arg11[%c0_54, %c0_55] : memref<1x8xf32, #tpu.memory_space<vmem>>, vector<1x8xf32>
    %c0_56 = arith.constant 0 : index
    %c0_57 = arith.constant 0 : index
    %71 = vector.load %arg12[%c0_56, %c0_57] : memref<1x8xf32, #tpu.memory_space<vmem>>, vector<1x8xf32>
    %c0_58 = arith.constant 0 : index
    %c0_59 = arith.constant 0 : index
    %72 = vector.load %arg13[%c0_58, %c0_59] : memref<8x8xf32, #tpu.memory_space<vmem>>, vector<8x8xf32>
    %cst_60 = arith.constant dense<0.000000e+00> : vector<8x8xf32>
    %73 = tpu.matmul %26, %68, %cst_60 {dimension_numbers = #tpu.dot_dimension_numbers<[1], [0], [0], [1], [0, 0, 1, 1], [], []>} : vector<8x4xf32>, vector<4x8xf32>, vector<8x8xf32> -> vector<8x8xf32>
    %cst_61 = arith.constant dense<0.000000e+00> : vector<8x8xf32>
    %74 = tpu.matmul %26, %69, %cst_61 {dimension_numbers = #tpu.dot_dimension_numbers<[1], [0], [0], [1], [0, 0, 1, 1], [], []>} : vector<8x4xf32>, vector<4x8xf32>, vector<8x8xf32> -> vector<8x8xf32>
    %75 = vector.shape_cast %73 : vector<8x8xf32> to vector<8x1x8xf32>
    %76 = vector.shape_cast %74 : vector<8x8xf32> to vector<1x8x8xf32>
    %77 = vector.broadcast %75 : vector<8x1x8xf32> to vector<8x8x8xf32>
    %78 = vector.broadcast %76 : vector<1x8x8xf32> to vector<8x8x8xf32>
    %79 = arith.addf %77, %78 : vector<8x8x8xf32>
    %80 = vector.shape_cast %70 : vector<1x8xf32> to vector<1x1x8xf32>
    %81 = vector.broadcast %80 : vector<1x1x8xf32> to vector<8x8x8xf32>
    %82 = arith.addf %79, %81 : vector<8x8x8xf32>
    %cst_62 = arith.constant 0.000000e+00 : f32
    %83 = vector.broadcast %cst_62 : f32 to vector<8x8x8xf32>
    %84 = arith.cmpf ogt, %82, %83 : vector<8x8x8xf32>
    %cst_63 = arith.constant 2.000000e-01 : f32
    %85 = vector.broadcast %cst_63 : f32 to vector<8x8x8xf32>
    %86 = arith.mulf %85, %82 : vector<8x8x8xf32>
    %87 = arith.select %84, %82, %86 : vector<8x8x8xi1>, vector<8x8x8xf32>
    %88 = vector.shape_cast %71 : vector<1x8xf32> to vector<1x1x8xf32>
    %89 = vector.broadcast %88 : vector<1x1x8xf32> to vector<8x8x8xf32>
    %90 = arith.mulf %87, %89 : vector<8x8x8xf32>
    %cst_64 = arith.constant dense<0.000000e+00> : vector<8x8xf32>
    %91 = vector.multi_reduction <add>, %90, %cst_64 [2] : vector<8x8x8xf32> to vector<8x8xf32>
    %92 = arith.addf %91, %72 : vector<8x8xf32>
    %cst_65 = arith.constant dense<0xFF800000> : vector<8xf32>
    %93 = vector.multi_reduction <maximumf>, %92, %cst_65 [1] : vector<8x8xf32> to vector<8xf32>
    %94 = vector.shape_cast %93 : vector<8xf32> to vector<8x1xf32>
    %95 = vector.broadcast %94 : vector<8x1xf32> to vector<8x8xf32>
    %96 = arith.subf %92, %95 : vector<8x8xf32>
    %97 = math.exp %96 : vector<8x8xf32>
    %cst_66 = arith.constant dense<0.000000e+00> : vector<8xf32>
    %98 = vector.multi_reduction <add>, %97, %cst_66 [1] : vector<8x8xf32> to vector<8xf32>
    %99 = vector.shape_cast %98 : vector<8xf32> to vector<8x1xf32>
    %100 = vector.broadcast %99 : vector<8x1xf32> to vector<8x8xf32>
    %101 = arith.divf %97, %100 : vector<8x8xf32>
    %cst_67 = arith.constant dense<0.000000e+00> : vector<8x4xf32>
    %102 = tpu.matmul %101, %26, %cst_67 {dimension_numbers = #tpu.dot_dimension_numbers<[1], [0], [0], [1], [0, 0, 1, 1], [], []>} : vector<8x8xf32>, vector<8x4xf32>, vector<8x4xf32> -> vector<8x4xf32>
    %103 = arith.negf %102 : vector<8x4xf32>
    %104 = math.exp %103 : vector<8x4xf32>
    %cst_68 = arith.constant 1.000000e+00 : f32
    %105 = vector.broadcast %cst_68 : f32 to vector<8x4xf32>
    %106 = arith.addf %105, %104 : vector<8x4xf32>
    %107 = arith.divf %105, %106 : vector<8x4xf32>
    %c0_69 = arith.constant 0 : index
    %c0_70 = arith.constant 0 : index
    %108 = vector.load %arg21[%c0_69, %c0_70] : memref<8x12xf32, #tpu.memory_space<vmem>>, vector<8x4xf32>
    tpu.vector_store %arg21[%c0_69, %c0_70], %26 {strides = array<i32>} : memref<8x12xf32, #tpu.memory_space<vmem>>, vector<8x4xf32>,
    %c0_71 = arith.constant 0 : index
    %c4_72 = arith.constant 4 : index
    %109 = vector.load %arg21[%c0_71, %c4_72] : memref<8x12xf32, #tpu.memory_space<vmem>>, vector<8x4xf32>
    tpu.vector_store %arg21[%c0_71, %c4_72], %67 {strides = array<i32>} : memref<8x12xf32, #tpu.memory_space<vmem>>, vector<8x4xf32>,
    %c0_73 = arith.constant 0 : index
    %c8_74 = arith.constant 8 : index
    %110 = vector.load %arg21[%c0_73, %c8_74] : memref<8x12xf32, #tpu.memory_space<vmem>>, vector<8x4xf32>
    tpu.vector_store %arg21[%c0_73, %c8_74], %107 {strides = array<i32>} : memref<8x12xf32, #tpu.memory_space<vmem>>, vector<8x4xf32>,
    %c0_75 = arith.constant 0 : index
    %c0_76 = arith.constant 0 : index
    %111 = vector.load %arg21[%c0_75, %c0_76] : memref<8x12xf32, #tpu.memory_space<vmem>>, vector<8x12xf32>
    %c0_77 = arith.constant 0 : index
    %c0_78 = arith.constant 0 : index
    %112 = vector.load %arg14[%c0_77, %c0_78] : memref<12x48xf32, #tpu.memory_space<vmem>>, vector<12x48xf32>
    %c0_79 = arith.constant 0 : index
    %c0_80 = arith.constant 0 : index
    %113 = vector.load %arg15[%c0_79, %c0_80] : memref<16x48xf32, #tpu.memory_space<vmem>>, vector<16x48xf32>
    %c0_81 = arith.constant 0 : index
    %c0_82 = arith.constant 0 : index
    %114 = vector.load %arg16[%c0_81, %c0_82] : memref<1x48xf32, #tpu.memory_space<vmem>>, vector<1x48xf32>
    %c0_83 = arith.constant 0 : index
    %c0_84 = arith.constant 0 : index
    %115 = vector.load %arg17[%c0_83, %c0_84] : memref<1x48xf32, #tpu.memory_space<vmem>>, vector<1x48xf32>
    %cst_85 = arith.constant dense<0.000000e+00> : vector<8x48xf32>
    %116 = tpu.matmul %111, %112, %cst_85 {dimension_numbers = #tpu.dot_dimension_numbers<[1], [0], [0], [1], [0, 0, 1, 1], [], []>} : vector<8x12xf32>, vector<12x48xf32>, vector<8x48xf32> -> vector<8x48xf32>
    %117 = vector.broadcast %114 : vector<1x48xf32> to vector<8x48xf32>
    %118 = arith.addf %116, %117 : vector<8x48xf32>
    %cst_86 = arith.constant 0.000000e+00 : f32
    %119 = vector.broadcast %cst_86 : f32 to vector<1x16xf32>
    %cst_87 = arith.constant dense<0.000000e+00> : vector<1x48xf32>
    %120 = tpu.matmul %119, %113, %cst_87 {dimension_numbers = #tpu.dot_dimension_numbers<[1], [0], [0], [1], [0, 0, 1, 1], [], []>} : vector<1x16xf32>, vector<16x48xf32>, vector<1x48xf32> -> vector<1x48xf32>
    %121 = arith.addf %120, %115 : vector<1x48xf32>
    %122 = vector.extract_strided_slice %118 {offsets = [0, 0], sizes = [1, 48], strides = [1, 1]} : vector<8x48xf32> to vector<1x48xf32>
    %123 = vector.extract_strided_slice %122 {offsets = [0, 0], sizes = [1, 16], strides = [1, 1]} : vector<1x48xf32> to vector<1x16xf32>
    %124 = vector.extract_strided_slice %121 {offsets = [0, 0], sizes = [1, 16], strides = [1, 1]} : vector<1x48xf32> to vector<1x16xf32>
    %125 = arith.addf %123, %124 : vector<1x16xf32>
    %126 = arith.negf %125 : vector<1x16xf32>
    %127 = math.exp %126 : vector<1x16xf32>
    %cst_88 = arith.constant 1.000000e+00 : f32
    %128 = vector.broadcast %cst_88 : f32 to vector<1x16xf32>
    %129 = arith.addf %128, %127 : vector<1x16xf32>
    %130 = arith.divf %128, %129 : vector<1x16xf32>
    %131 = vector.extract_strided_slice %122 {offsets = [0, 16], sizes = [1, 16], strides = [1, 1]} : vector<1x48xf32> to vector<1x16xf32>
    %132 = vector.extract_strided_slice %121 {offsets = [0, 16], sizes = [1, 16], strides = [1, 1]} : vector<1x48xf32> to vector<1x16xf32>
    %133 = arith.addf %131, %132 : vector<1x16xf32>
    %134 = arith.negf %133 : vector<1x16xf32>
    %135 = math.exp %134 : vector<1x16xf32>
    %cst_89 = arith.constant 1.000000e+00 : f32
    %136 = vector.broadcast %cst_89 : f32 to vector<1x16xf32>
    %137 = arith.addf %136, %135 : vector<1x16xf32>
    %138 = arith.divf %136, %137 : vector<1x16xf32>
    %139 = vector.extract_strided_slice %122 {offsets = [0, 32], sizes = [1, 16], strides = [1, 1]} : vector<1x48xf32> to vector<1x16xf32>
    %140 = vector.extract_strided_slice %121 {offsets = [0, 32], sizes = [1, 16], strides = [1, 1]} : vector<1x48xf32> to vector<1x16xf32>
    %141 = arith.mulf %130, %140 : vector<1x16xf32>
    %142 = arith.addf %139, %141 : vector<1x16xf32>
    %143 = math.tanh %142 : vector<1x16xf32>
    %cst_90 = arith.constant 1.000000e+00 : f32
    %144 = vector.broadcast %cst_90 : f32 to vector<1x16xf32>
    %145 = arith.subf %144, %138 : vector<1x16xf32>
    %146 = arith.mulf %145, %143 : vector<1x16xf32>
    %147 = arith.mulf %138, %119 : vector<1x16xf32>
    %148 = arith.addf %146, %147 : vector<1x16xf32>
    %c0_91 = arith.constant 0 : index
    %c0_92 = arith.constant 0 : index
    %149 = vector.load %arg22[%c0_91, %c0_92] : memref<8x16xf32, #tpu.memory_space<vmem>>, vector<1x16xf32>
    tpu.vector_store %arg22[%c0_91, %c0_92], %148 {strides = array<i32>} : memref<8x16xf32, #tpu.memory_space<vmem>>, vector<1x16xf32>,
    %cst_93 = arith.constant dense<0.000000e+00> : vector<1x48xf32>
    %150 = tpu.matmul %148, %113, %cst_93 {dimension_numbers = #tpu.dot_dimension_numbers<[1], [0], [0], [1], [0, 0, 1, 1], [], []>} : vector<1x16xf32>, vector<16x48xf32>, vector<1x48xf32> -> vector<1x48xf32>
    %151 = arith.addf %150, %115 : vector<1x48xf32>
    %152 = vector.extract_strided_slice %118 {offsets = [1, 0], sizes = [1, 48], strides = [1, 1]} : vector<8x48xf32> to vector<1x48xf32>
    %153 = vector.extract_strided_slice %152 {offsets = [0, 0], sizes = [1, 16], strides = [1, 1]} : vector<1x48xf32> to vector<1x16xf32>
    %154 = vector.extract_strided_slice %151 {offsets = [0, 0], sizes = [1, 16], strides = [1, 1]} : vector<1x48xf32> to vector<1x16xf32>
    %155 = arith.addf %153, %154 : vector<1x16xf32>
    %156 = arith.negf %155 : vector<1x16xf32>
    %157 = math.exp %156 : vector<1x16xf32>
    %cst_94 = arith.constant 1.000000e+00 : f32
    %158 = vector.broadcast %cst_94 : f32 to vector<1x16xf32>
    %159 = arith.addf %158, %157 : vector<1x16xf32>
    %160 = arith.divf %158, %159 : vector<1x16xf32>
    %161 = vector.extract_strided_slice %152 {offsets = [0, 16], sizes = [1, 16], strides = [1, 1]} : vector<1x48xf32> to vector<1x16xf32>
    %162 = vector.extract_strided_slice %151 {offsets = [0, 16], sizes = [1, 16], strides = [1, 1]} : vector<1x48xf32> to vector<1x16xf32>
    %163 = arith.addf %161, %162 : vector<1x16xf32>
    %164 = arith.negf %163 : vector<1x16xf32>
    %165 = math.exp %164 : vector<1x16xf32>
    %cst_95 = arith.constant 1.000000e+00 : f32
    %166 = vector.broadcast %cst_95 : f32 to vector<1x16xf32>
    %167 = arith.addf %166, %165 : vector<1x16xf32>
    %168 = arith.divf %166, %167 : vector<1x16xf32>
    %169 = vector.extract_strided_slice %152 {offsets = [0, 32], sizes = [1, 16], strides = [1, 1]} : vector<1x48xf32> to vector<1x16xf32>
    %170 = vector.extract_strided_slice %151 {offsets = [0, 32], sizes = [1, 16], strides = [1, 1]} : vector<1x48xf32> to vector<1x16xf32>
    %171 = arith.mulf %160, %170 : vector<1x16xf32>
    %172 = arith.addf %169, %171 : vector<1x16xf32>
    %173 = math.tanh %172 : vector<1x16xf32>
    %cst_96 = arith.constant 1.000000e+00 : f32
    %174 = vector.broadcast %cst_96 : f32 to vector<1x16xf32>
    %175 = arith.subf %174, %168 : vector<1x16xf32>
    %176 = arith.mulf %175, %173 : vector<1x16xf32>
    %177 = arith.mulf %168, %148 : vector<1x16xf32>
    %178 = arith.addf %176, %177 : vector<1x16xf32>
    %c1_97 = arith.constant 1 : index
    %c0_98 = arith.constant 0 : index
    %179 = vector.load %arg22[%c1_97, %c0_98] : memref<8x16xf32, #tpu.memory_space<vmem>>, vector<1x16xf32>
    tpu.vector_store %arg22[%c1_97, %c0_98], %178 {strides = array<i32>} : memref<8x16xf32, #tpu.memory_space<vmem>>, vector<1x16xf32>,
    %cst_99 = arith.constant dense<0.000000e+00> : vector<1x48xf32>
    %180 = tpu.matmul %178, %113, %cst_99 {dimension_numbers = #tpu.dot_dimension_numbers<[1], [0], [0], [1], [0, 0, 1, 1], [], []>} : vector<1x16xf32>, vector<16x48xf32>, vector<1x48xf32> -> vector<1x48xf32>
    %181 = arith.addf %180, %115 : vector<1x48xf32>
    %182 = vector.extract_strided_slice %118 {offsets = [2, 0], sizes = [1, 48], strides = [1, 1]} : vector<8x48xf32> to vector<1x48xf32>
    %183 = vector.extract_strided_slice %182 {offsets = [0, 0], sizes = [1, 16], strides = [1, 1]} : vector<1x48xf32> to vector<1x16xf32>
    %184 = vector.extract_strided_slice %181 {offsets = [0, 0], sizes = [1, 16], strides = [1, 1]} : vector<1x48xf32> to vector<1x16xf32>
    %185 = arith.addf %183, %184 : vector<1x16xf32>
    %186 = arith.negf %185 : vector<1x16xf32>
    %187 = math.exp %186 : vector<1x16xf32>
    %cst_100 = arith.constant 1.000000e+00 : f32
    %188 = vector.broadcast %cst_100 : f32 to vector<1x16xf32>
    %189 = arith.addf %188, %187 : vector<1x16xf32>
    %190 = arith.divf %188, %189 : vector<1x16xf32>
    %191 = vector.extract_strided_slice %182 {offsets = [0, 16], sizes = [1, 16], strides = [1, 1]} : vector<1x48xf32> to vector<1x16xf32>
    %192 = vector.extract_strided_slice %181 {offsets = [0, 16], sizes = [1, 16], strides = [1, 1]} : vector<1x48xf32> to vector<1x16xf32>
    %193 = arith.addf %191, %192 : vector<1x16xf32>
    %194 = arith.negf %193 : vector<1x16xf32>
    %195 = math.exp %194 : vector<1x16xf32>
    %cst_101 = arith.constant 1.000000e+00 : f32
    %196 = vector.broadcast %cst_101 : f32 to vector<1x16xf32>
    %197 = arith.addf %196, %195 : vector<1x16xf32>
    %198 = arith.divf %196, %197 : vector<1x16xf32>
    %199 = vector.extract_strided_slice %182 {offsets = [0, 32], sizes = [1, 16], strides = [1, 1]} : vector<1x48xf32> to vector<1x16xf32>
    %200 = vector.extract_strided_slice %181 {offsets = [0, 32], sizes = [1, 16], strides = [1, 1]} : vector<1x48xf32> to vector<1x16xf32>
    %201 = arith.mulf %190, %200 : vector<1x16xf32>
    %202 = arith.addf %199, %201 : vector<1x16xf32>
    %203 = math.tanh %202 : vector<1x16xf32>
    %cst_102 = arith.constant 1.000000e+00 : f32
    %204 = vector.broadcast %cst_102 : f32 to vector<1x16xf32>
    %205 = arith.subf %204, %198 : vector<1x16xf32>
    %206 = arith.mulf %205, %203 : vector<1x16xf32>
    %207 = arith.mulf %198, %178 : vector<1x16xf32>
    %208 = arith.addf %206, %207 : vector<1x16xf32>
    %c2_103 = arith.constant 2 : index
    %c0_104 = arith.constant 0 : index
    %209 = vector.load %arg22[%c2_103, %c0_104] : memref<8x16xf32, #tpu.memory_space<vmem>>, vector<1x16xf32>
    tpu.vector_store %arg22[%c2_103, %c0_104], %208 {strides = array<i32>} : memref<8x16xf32, #tpu.memory_space<vmem>>, vector<1x16xf32>,
    %cst_105 = arith.constant dense<0.000000e+00> : vector<1x48xf32>
    %210 = tpu.matmul %208, %113, %cst_105 {dimension_numbers = #tpu.dot_dimension_numbers<[1], [0], [0], [1], [0, 0, 1, 1], [], []>} : vector<1x16xf32>, vector<16x48xf32>, vector<1x48xf32> -> vector<1x48xf32>
    %211 = arith.addf %210, %115 : vector<1x48xf32>
    %212 = vector.extract_strided_slice %118 {offsets = [3, 0], sizes = [1, 48], strides = [1, 1]} : vector<8x48xf32> to vector<1x48xf32>
    %213 = vector.extract_strided_slice %212 {offsets = [0, 0], sizes = [1, 16], strides = [1, 1]} : vector<1x48xf32> to vector<1x16xf32>
    %214 = vector.extract_strided_slice %211 {offsets = [0, 0], sizes = [1, 16], strides = [1, 1]} : vector<1x48xf32> to vector<1x16xf32>
    %215 = arith.addf %213, %214 : vector<1x16xf32>
    %216 = arith.negf %215 : vector<1x16xf32>
    %217 = math.exp %216 : vector<1x16xf32>
    %cst_106 = arith.constant 1.000000e+00 : f32
    %218 = vector.broadcast %cst_106 : f32 to vector<1x16xf32>
    %219 = arith.addf %218, %217 : vector<1x16xf32>
    %220 = arith.divf %218, %219 : vector<1x16xf32>
    %221 = vector.extract_strided_slice %212 {offsets = [0, 16], sizes = [1, 16], strides = [1, 1]} : vector<1x48xf32> to vector<1x16xf32>
    %222 = vector.extract_strided_slice %211 {offsets = [0, 16], sizes = [1, 16], strides = [1, 1]} : vector<1x48xf32> to vector<1x16xf32>
    %223 = arith.addf %221, %222 : vector<1x16xf32>
    %224 = arith.negf %223 : vector<1x16xf32>
    %225 = math.exp %224 : vector<1x16xf32>
    %cst_107 = arith.constant 1.000000e+00 : f32
    %226 = vector.broadcast %cst_107 : f32 to vector<1x16xf32>
    %227 = arith.addf %226, %225 : vector<1x16xf32>
    %228 = arith.divf %226, %227 : vector<1x16xf32>
    %229 = vector.extract_strided_slice %212 {offsets = [0, 32], sizes = [1, 16], strides = [1, 1]} : vector<1x48xf32> to vector<1x16xf32>
    %230 = vector.extract_strided_slice %211 {offsets = [0, 32], sizes = [1, 16], strides = [1, 1]} : vector<1x48xf32> to vector<1x16xf32>
    %231 = arith.mulf %220, %230 : vector<1x16xf32>
    %232 = arith.addf %229, %231 : vector<1x16xf32>
    %233 = math.tanh %232 : vector<1x16xf32>
    %cst_108 = arith.constant 1.000000e+00 : f32
    %234 = vector.broadcast %cst_108 : f32 to vector<1x16xf32>
    %235 = arith.subf %234, %228 : vector<1x16xf32>
    %236 = arith.mulf %235, %233 : vector<1x16xf32>
    %237 = arith.mulf %228, %208 : vector<1x16xf32>
    %238 = arith.addf %236, %237 : vector<1x16xf32>
    %c3_109 = arith.constant 3 : index
    %c0_110 = arith.constant 0 : index
    %239 = vector.load %arg22[%c3_109, %c0_110] : memref<8x16xf32, #tpu.memory_space<vmem>>, vector<1x16xf32>
    tpu.vector_store %arg22[%c3_109, %c0_110], %238 {strides = array<i32>} : memref<8x16xf32, #tpu.memory_space<vmem>>, vector<1x16xf32>,
    %cst_111 = arith.constant dense<0.000000e+00> : vector<1x48xf32>
    %240 = tpu.matmul %238, %113, %cst_111 {dimension_numbers = #tpu.dot_dimension_numbers<[1], [0], [0], [1], [0, 0, 1, 1], [], []>} : vector<1x16xf32>, vector<16x48xf32>, vector<1x48xf32> -> vector<1x48xf32>
    %241 = arith.addf %240, %115 : vector<1x48xf32>
    %242 = vector.extract_strided_slice %118 {offsets = [4, 0], sizes = [1, 48], strides = [1, 1]} : vector<8x48xf32> to vector<1x48xf32>
    %243 = vector.extract_strided_slice %242 {offsets = [0, 0], sizes = [1, 16], strides = [1, 1]} : vector<1x48xf32> to vector<1x16xf32>
    %244 = vector.extract_strided_slice %241 {offsets = [0, 0], sizes = [1, 16], strides = [1, 1]} : vector<1x48xf32> to vector<1x16xf32>
    %245 = arith.addf %243, %244 : vector<1x16xf32>
    %246 = arith.negf %245 : vector<1x16xf32>
    %247 = math.exp %246 : vector<1x16xf32>
    %cst_112 = arith.constant 1.000000e+00 : f32
    %248 = vector.broadcast %cst_112 : f32 to vector<1x16xf32>
    %249 = arith.addf %248, %247 : vector<1x16xf32>
    %250 = arith.divf %248, %249 : vector<1x16xf32>
    %251 = vector.extract_strided_slice %242 {offsets = [0, 16], sizes = [1, 16], strides = [1, 1]} : vector<1x48xf32> to vector<1x16xf32>
    %252 = vector.extract_strided_slice %241 {offsets = [0, 16], sizes = [1, 16], strides = [1, 1]} : vector<1x48xf32> to vector<1x16xf32>
    %253 = arith.addf %251, %252 : vector<1x16xf32>
    %254 = arith.negf %253 : vector<1x16xf32>
    %255 = math.exp %254 : vector<1x16xf32>
    %cst_113 = arith.constant 1.000000e+00 : f32
    %256 = vector.broadcast %cst_113 : f32 to vector<1x16xf32>
    %257 = arith.addf %256, %255 : vector<1x16xf32>
    %258 = arith.divf %256, %257 : vector<1x16xf32>
    %259 = vector.extract_strided_slice %242 {offsets = [0, 32], sizes = [1, 16], strides = [1, 1]} : vector<1x48xf32> to vector<1x16xf32>
    %260 = vector.extract_strided_slice %241 {offsets = [0, 32], sizes = [1, 16], strides = [1, 1]} : vector<1x48xf32> to vector<1x16xf32>
    %261 = arith.mulf %250, %260 : vector<1x16xf32>
    %262 = arith.addf %259, %261 : vector<1x16xf32>
    %263 = math.tanh %262 : vector<1x16xf32>
    %cst_114 = arith.constant 1.000000e+00 : f32
    %264 = vector.broadcast %cst_114 : f32 to vector<1x16xf32>
    %265 = arith.subf %264, %258 : vector<1x16xf32>
    %266 = arith.mulf %265, %263 : vector<1x16xf32>
    %267 = arith.mulf %258, %238 : vector<1x16xf32>
    %268 = arith.addf %266, %267 : vector<1x16xf32>
    %c4_115 = arith.constant 4 : index
    %c0_116 = arith.constant 0 : index
    %269 = vector.load %arg22[%c4_115, %c0_116] : memref<8x16xf32, #tpu.memory_space<vmem>>, vector<1x16xf32>
    tpu.vector_store %arg22[%c4_115, %c0_116], %268 {strides = array<i32>} : memref<8x16xf32, #tpu.memory_space<vmem>>, vector<1x16xf32>,
    %cst_117 = arith.constant dense<0.000000e+00> : vector<1x48xf32>
    %270 = tpu.matmul %268, %113, %cst_117 {dimension_numbers = #tpu.dot_dimension_numbers<[1], [0], [0], [1], [0, 0, 1, 1], [], []>} : vector<1x16xf32>, vector<16x48xf32>, vector<1x48xf32> -> vector<1x48xf32>
    %271 = arith.addf %270, %115 : vector<1x48xf32>
    %272 = vector.extract_strided_slice %118 {offsets = [5, 0], sizes = [1, 48], strides = [1, 1]} : vector<8x48xf32> to vector<1x48xf32>
    %273 = vector.extract_strided_slice %272 {offsets = [0, 0], sizes = [1, 16], strides = [1, 1]} : vector<1x48xf32> to vector<1x16xf32>
    %274 = vector.extract_strided_slice %271 {offsets = [0, 0], sizes = [1, 16], strides = [1, 1]} : vector<1x48xf32> to vector<1x16xf32>
    %275 = arith.addf %273, %274 : vector<1x16xf32>
    %276 = arith.negf %275 : vector<1x16xf32>
    %277 = math.exp %276 : vector<1x16xf32>
    %cst_118 = arith.constant 1.000000e+00 : f32
    %278 = vector.broadcast %cst_118 : f32 to vector<1x16xf32>
    %279 = arith.addf %278, %277 : vector<1x16xf32>
    %280 = arith.divf %278, %279 : vector<1x16xf32>
    %281 = vector.extract_strided_slice %272 {offsets = [0, 16], sizes = [1, 16], strides = [1, 1]} : vector<1x48xf32> to vector<1x16xf32>
    %282 = vector.extract_strided_slice %271 {offsets = [0, 16], sizes = [1, 16], strides = [1, 1]} : vector<1x48xf32> to vector<1x16xf32>
    %283 = arith.addf %281, %282 : vector<1x16xf32>
    %284 = arith.negf %283 : vector<1x16xf32>
    %285 = math.exp %284 : vector<1x16xf32>
    %cst_119 = arith.constant 1.000000e+00 : f32
    %286 = vector.broadcast %cst_119 : f32 to vector<1x16xf32>
    %287 = arith.addf %286, %285 : vector<1x16xf32>
    %288 = arith.divf %286, %287 : vector<1x16xf32>
    %289 = vector.extract_strided_slice %272 {offsets = [0, 32], sizes = [1, 16], strides = [1, 1]} : vector<1x48xf32> to vector<1x16xf32>
    %290 = vector.extract_strided_slice %271 {offsets = [0, 32], sizes = [1, 16], strides = [1, 1]} : vector<1x48xf32> to vector<1x16xf32>
    %291 = arith.mulf %280, %290 : vector<1x16xf32>
    %292 = arith.addf %289, %291 : vector<1x16xf32>
    %293 = math.tanh %292 : vector<1x16xf32>
    %cst_120 = arith.constant 1.000000e+00 : f32
    %294 = vector.broadcast %cst_120 : f32 to vector<1x16xf32>
    %295 = arith.subf %294, %288 : vector<1x16xf32>
    %296 = arith.mulf %295, %293 : vector<1x16xf32>
    %297 = arith.mulf %288, %268 : vector<1x16xf32>
    %298 = arith.addf %296, %297 : vector<1x16xf32>
    %c5_121 = arith.constant 5 : index
    %c0_122 = arith.constant 0 : index
    %299 = vector.load %arg22[%c5_121, %c0_122] : memref<8x16xf32, #tpu.memory_space<vmem>>, vector<1x16xf32>
    tpu.vector_store %arg22[%c5_121, %c0_122], %298 {strides = array<i32>} : memref<8x16xf32, #tpu.memory_space<vmem>>, vector<1x16xf32>,
    %cst_123 = arith.constant dense<0.000000e+00> : vector<1x48xf32>
    %300 = tpu.matmul %298, %113, %cst_123 {dimension_numbers = #tpu.dot_dimension_numbers<[1], [0], [0], [1], [0, 0, 1, 1], [], []>} : vector<1x16xf32>, vector<16x48xf32>, vector<1x48xf32> -> vector<1x48xf32>
    %301 = arith.addf %300, %115 : vector<1x48xf32>
    %302 = vector.extract_strided_slice %118 {offsets = [6, 0], sizes = [1, 48], strides = [1, 1]} : vector<8x48xf32> to vector<1x48xf32>
    %303 = vector.extract_strided_slice %302 {offsets = [0, 0], sizes = [1, 16], strides = [1, 1]} : vector<1x48xf32> to vector<1x16xf32>
    %304 = vector.extract_strided_slice %301 {offsets = [0, 0], sizes = [1, 16], strides = [1, 1]} : vector<1x48xf32> to vector<1x16xf32>
    %305 = arith.addf %303, %304 : vector<1x16xf32>
    %306 = arith.negf %305 : vector<1x16xf32>
    %307 = math.exp %306 : vector<1x16xf32>
    %cst_124 = arith.constant 1.000000e+00 : f32
    %308 = vector.broadcast %cst_124 : f32 to vector<1x16xf32>
    %309 = arith.addf %308, %307 : vector<1x16xf32>
    %310 = arith.divf %308, %309 : vector<1x16xf32>
    %311 = vector.extract_strided_slice %302 {offsets = [0, 16], sizes = [1, 16], strides = [1, 1]} : vector<1x48xf32> to vector<1x16xf32>
    %312 = vector.extract_strided_slice %301 {offsets = [0, 16], sizes = [1, 16], strides = [1, 1]} : vector<1x48xf32> to vector<1x16xf32>
    %313 = arith.addf %311, %312 : vector<1x16xf32>
    %314 = arith.negf %313 : vector<1x16xf32>
    %315 = math.exp %314 : vector<1x16xf32>
    %cst_125 = arith.constant 1.000000e+00 : f32
    %316 = vector.broadcast %cst_125 : f32 to vector<1x16xf32>
    %317 = arith.addf %316, %315 : vector<1x16xf32>
    %318 = arith.divf %316, %317 : vector<1x16xf32>
    %319 = vector.extract_strided_slice %302 {offsets = [0, 32], sizes = [1, 16], strides = [1, 1]} : vector<1x48xf32> to vector<1x16xf32>
    %320 = vector.extract_strided_slice %301 {offsets = [0, 32], sizes = [1, 16], strides = [1, 1]} : vector<1x48xf32> to vector<1x16xf32>
    %321 = arith.mulf %310, %320 : vector<1x16xf32>
    %322 = arith.addf %319, %321 : vector<1x16xf32>
    %323 = math.tanh %322 : vector<1x16xf32>
    %cst_126 = arith.constant 1.000000e+00 : f32
    %324 = vector.broadcast %cst_126 : f32 to vector<1x16xf32>
    %325 = arith.subf %324, %318 : vector<1x16xf32>
    %326 = arith.mulf %325, %323 : vector<1x16xf32>
    %327 = arith.mulf %318, %298 : vector<1x16xf32>
    %328 = arith.addf %326, %327 : vector<1x16xf32>
    %c6_127 = arith.constant 6 : index
    %c0_128 = arith.constant 0 : index
    %329 = vector.load %arg22[%c6_127, %c0_128] : memref<8x16xf32, #tpu.memory_space<vmem>>, vector<1x16xf32>
    tpu.vector_store %arg22[%c6_127, %c0_128], %328 {strides = array<i32>} : memref<8x16xf32, #tpu.memory_space<vmem>>, vector<1x16xf32>,
    %cst_129 = arith.constant dense<0.000000e+00> : vector<1x48xf32>
    %330 = tpu.matmul %328, %113, %cst_129 {dimension_numbers = #tpu.dot_dimension_numbers<[1], [0], [0], [1], [0, 0, 1, 1], [], []>} : vector<1x16xf32>, vector<16x48xf32>, vector<1x48xf32> -> vector<1x48xf32>
    %331 = arith.addf %330, %115 : vector<1x48xf32>
    %332 = vector.extract_strided_slice %118 {offsets = [7, 0], sizes = [1, 48], strides = [1, 1]} : vector<8x48xf32> to vector<1x48xf32>
    %333 = vector.extract_strided_slice %332 {offsets = [0, 0], sizes = [1, 16], strides = [1, 1]} : vector<1x48xf32> to vector<1x16xf32>
    %334 = vector.extract_strided_slice %331 {offsets = [0, 0], sizes = [1, 16], strides = [1, 1]} : vector<1x48xf32> to vector<1x16xf32>
    %335 = arith.addf %333, %334 : vector<1x16xf32>
    %336 = arith.negf %335 : vector<1x16xf32>
    %337 = math.exp %336 : vector<1x16xf32>
    %cst_130 = arith.constant 1.000000e+00 : f32
    %338 = vector.broadcast %cst_130 : f32 to vector<1x16xf32>
    %339 = arith.addf %338, %337 : vector<1x16xf32>
    %340 = arith.divf %338, %339 : vector<1x16xf32>
    %341 = vector.extract_strided_slice %332 {offsets = [0, 16], sizes = [1, 16], strides = [1, 1]} : vector<1x48xf32> to vector<1x16xf32>
    %342 = vector.extract_strided_slice %331 {offsets = [0, 16], sizes = [1, 16], strides = [1, 1]} : vector<1x48xf32> to vector<1x16xf32>
    %343 = arith.addf %341, %342 : vector<1x16xf32>
    %344 = arith.negf %343 : vector<1x16xf32>
    %345 = math.exp %344 : vector<1x16xf32>
    %cst_131 = arith.constant 1.000000e+00 : f32
    %346 = vector.broadcast %cst_131 : f32 to vector<1x16xf32>
    %347 = arith.addf %346, %345 : vector<1x16xf32>
    %348 = arith.divf %346, %347 : vector<1x16xf32>
    %349 = vector.extract_strided_slice %332 {offsets = [0, 32], sizes = [1, 16], strides = [1, 1]} : vector<1x48xf32> to vector<1x16xf32>
    %350 = vector.extract_strided_slice %331 {offsets = [0, 32], sizes = [1, 16], strides = [1, 1]} : vector<1x48xf32> to vector<1x16xf32>
    %351 = arith.mulf %340, %350 : vector<1x16xf32>
    %352 = arith.addf %349, %351 : vector<1x16xf32>
    %353 = math.tanh %352 : vector<1x16xf32>
    %cst_132 = arith.constant 1.000000e+00 : f32
    %354 = vector.broadcast %cst_132 : f32 to vector<1x16xf32>
    %355 = arith.subf %354, %348 : vector<1x16xf32>
    %356 = arith.mulf %355, %353 : vector<1x16xf32>
    %357 = arith.mulf %348, %328 : vector<1x16xf32>
    %358 = arith.addf %356, %357 : vector<1x16xf32>
    %c7 = arith.constant 7 : index
    %c0_133 = arith.constant 0 : index
    %359 = vector.load %arg22[%c7, %c0_133] : memref<8x16xf32, #tpu.memory_space<vmem>>, vector<1x16xf32>
    tpu.vector_store %arg22[%c7, %c0_133], %358 {strides = array<i32>} : memref<8x16xf32, #tpu.memory_space<vmem>>, vector<1x16xf32>,
    %c0_134 = arith.constant 0 : index
    %c0_135 = arith.constant 0 : index
    %360 = vector.load %arg22[%c0_134, %c0_135] : memref<8x16xf32, #tpu.memory_space<vmem>>, vector<8x16xf32>
    %c0_136 = arith.constant 0 : index
    %c0_137 = arith.constant 0 : index
    %c0_138 = arith.constant 0 : index
    %361 = vector.load %arg18[%c0_136, %c0_137, %c0_138] : memref<1x8x16xf32, #tpu.memory_space<vmem>>, vector<1x8x16xf32>
    %362 = vector.shape_cast %361 : vector<1x8x16xf32> to vector<8x16xf32>
    %363 = vector.shape_cast %360 : vector<8x16xf32> to vector<1x8x16xf32>
    tpu.vector_store %arg18[%c0_136, %c0_137, %c0_138], %363 {strides = array<i32>} : memref<1x8x16xf32, #tpu.memory_space<vmem>>, vector<1x8x16xf32>,
    return
  }
  func.func @transform_0(%arg0: i32) -> (i32, i32, i32) {
    %c0_i32 = arith.constant 0 : i32
    %c0_i32_0 = arith.constant 0 : i32
    %c0_i32_1 = arith.constant 0 : i32
    return %arg0, %c0_i32, %c0_i32_0 : i32, i32, i32
  }
  func.func @transform_1(%arg0: i32) -> (i32, i32) {
    %c0_i32 = arith.constant 0 : i32
    %c0_i32_0 = arith.constant 0 : i32
    %c0_i32_1 = arith.constant 0 : i32
    return %c0_i32, %c0_i32_0 : i32, i32
  }
  func.func @transform_2(%arg0: i32) -> (i32, i32) {
    %c0_i32 = arith.constant 0 : i32
    %c0_i32_0 = arith.constant 0 : i32
    %c0_i32_1 = arith.constant 0 : i32
    return %c0_i32, %c0_i32_0 : i32, i32
  }
  func.func @transform_3(%arg0: i32) -> (i32, i32) {
    %c0_i32 = arith.constant 0 : i32
    %c0_i32_0 = arith.constant 0 : i32
    %c0_i32_1 = arith.constant 0 : i32
    return %c0_i32, %c0_i32_0 : i32, i32
  }
  func.func @transform_4(%arg0: i32) -> (i32, i32) {
    %c0_i32 = arith.constant 0 : i32
    %c0_i32_0 = arith.constant 0 : i32
    %c0_i32_1 = arith.constant 0 : i32
    return %c0_i32, %c0_i32_0 : i32, i32
  }
  func.func @transform_5(%arg0: i32) -> (i32, i32) {
    %c0_i32 = arith.constant 0 : i32
    %c0_i32_0 = arith.constant 0 : i32
    %c0_i32_1 = arith.constant 0 : i32
    return %c0_i32, %c0_i32_0 : i32, i32
  }
  func.func @transform_6(%arg0: i32) -> (i32, i32) {
    %c0_i32 = arith.constant 0 : i32
    %c0_i32_0 = arith.constant 0 : i32
    %c0_i32_1 = arith.constant 0 : i32
    return %c0_i32, %c0_i32_0 : i32, i32
  }
  func.func @transform_7(%arg0: i32) -> (i32, i32) {
    %c0_i32 = arith.constant 0 : i32
    %c0_i32_0 = arith.constant 0 : i32
    %c0_i32_1 = arith.constant 0 : i32
    return %c0_i32, %c0_i32_0 : i32, i32
  }
  func.func @transform_8(%arg0: i32) -> (i32, i32) {
    %c0_i32 = arith.constant 0 : i32
    %c0_i32_0 = arith.constant 0 : i32
    %c0_i32_1 = arith.constant 0 : i32
    return %c0_i32, %c0_i32_0 : i32, i32
  }
  func.func @transform_9(%arg0: i32) -> (i32, i32) {
    %c0_i32 = arith.constant 0 : i32
    %c0_i32_0 = arith.constant 0 : i32
    %c0_i32_1 = arith.constant 0 : i32
    return %c0_i32, %c0_i32_0 : i32, i32
  }
  func.func @transform_10(%arg0: i32) -> (i32, i32) {
    %c0_i32 = arith.constant 0 : i32
    %c0_i32_0 = arith.constant 0 : i32
    %c0_i32_1 = arith.constant 0 : i32
    return %c0_i32, %c0_i32_0 : i32, i32
  }
  func.func @transform_11(%arg0: i32) -> (i32, i32) {
    %c0_i32 = arith.constant 0 : i32
    %c0_i32_0 = arith.constant 0 : i32
    %c0_i32_1 = arith.constant 0 : i32
    return %c0_i32, %c0_i32_0 : i32, i32
  }
  func.func @transform_12(%arg0: i32) -> (i32, i32) {
    %c0_i32 = arith.constant 0 : i32
    %c0_i32_0 = arith.constant 0 : i32
    %c0_i32_1 = arith.constant 0 : i32
    return %c0_i32, %c0_i32_0 : i32, i32
  }
  func.func @transform_13(%arg0: i32) -> (i32, i32) {
    %c0_i32 = arith.constant 0 : i32
    %c0_i32_0 = arith.constant 0 : i32
    %c0_i32_1 = arith.constant 0 : i32
    return %c0_i32, %c0_i32_0 : i32, i32
  }
  func.func @transform_14(%arg0: i32) -> (i32, i32) {
    %c0_i32 = arith.constant 0 : i32
    %c0_i32_0 = arith.constant 0 : i32
    %c0_i32_1 = arith.constant 0 : i32
    return %c0_i32, %c0_i32_0 : i32, i32
  }
  func.func @transform_15(%arg0: i32) -> (i32, i32) {
    %c0_i32 = arith.constant 0 : i32
    %c0_i32_0 = arith.constant 0 : i32
    %c0_i32_1 = arith.constant 0 : i32
    return %c0_i32, %c0_i32_0 : i32, i32
  }
  func.func @transform_16(%arg0: i32) -> (i32, i32) {
    %c0_i32 = arith.constant 0 : i32
    %c0_i32_0 = arith.constant 0 : i32
    %c0_i32_1 = arith.constant 0 : i32
    return %c0_i32, %c0_i32_0 : i32, i32
  }
  func.func @transform_17(%arg0: i32) -> (i32, i32, i32) {
    %c0_i32 = arith.constant 0 : i32
    %c0_i32_0 = arith.constant 0 : i32
    %c0_i32_1 = arith.constant 0 : i32
    return %arg0, %c0_i32, %c0_i32_0 : i32, i32, i32
  }
}

</mosaic_0001>

<bundles_post_ra>
// kernel: tpu_custom_call.1
= control target key start
LH: loop header
LB: loop body
LE: loop exit
PB: predicated region body
PF: predicated region fallthrough
CT: control target
= control target key end

     0   :  { %s4486_s0 = inlined_call_operand.vmem [shape: f32[2,8,4], index: 0, kind: input, shape index: {}]   ;;  %s4487_s1 = inlined_call_operand.vmem [shape: f32[28,4], index: 1, kind: input, shape index: {}]   ;;  %s4488_s2 = inlined_call_operand.hbm [shape: f32[1,4], index: 2, kind: input, shape index: {}]   ;;  %s4489_s3 = inlined_call_operand.vmem [shape: f32[8,16], index: 3, kind: input, shape index: {}]   ;;  %s4490_s4 = inlined_call_operand.vmem [shape: f32[8,16], index: 4, kind: input, shape index: {}]   ;;  %s4491_s5 = inlined_call_operand.hbm [shape: f32[1,16], index: 5, kind: input, shape index: {}]   ;;  %s4492_s6 = inlined_call_operand.hbm [shape: f32[1,16], index: 6, kind: input, shape index: {}]   ;;  %s4493_s7 = inlined_call_operand.vmem [shape: f32[4,4], index: 7, kind: input, shape index: {}]   ;;  %s4494_s8 = inlined_call_operand.vmem [shape: f32[4,8], index: 8, kind: input, shape index: {}]   ;;  %s4495_s9 = inlined_call_operand.vmem [shape: f32[4,8], index: 9, kind: input, shape index: {}]   ;;  %s4496_s10 = inlined_call_operand.vmem [shape: f32[1,8], index: 10, kind: input, shape index: {}]   ;;  %s4497_s11 = inlined_call_operand.vmem [shape: f32[1,8], index: 11, kind: input, shape index: {}]   ;;  %s4498_s12 = inlined_call_operand.vmem [shape: f32[8,8], index: 12, kind: input, shape index: {}]   ;;  %s4499_s13 = inlined_call_operand.vmem [shape: f32[12,48], index: 13, kind: input, shape index: {}]   ;;  %s4500_s14 = inlined_call_operand.vmem [shape: f32[16,48], index: 14, kind: input, shape index: {}]   ;;  %s4501_s15 = inlined_call_operand.vmem [shape: f32[1,48], index: 15, kind: input, shape index: {}]   ;;  %s4502_s16 = inlined_call_operand.vmem [shape: f32[1,48], index: 16, kind: input, shape index: {}]   ;;  %s4503_s17 = inlined_call_operand.hbm [shape: f32[2,8,16], index: 17, kind: output, shape index: {}]  }
   0x1   :  { %4512 = sst [smem:[#allocation21_spill]] %s4486_s0 }
   0x2   :  { %4513 = sst [smem:[#allocation22_spill]] %s4487_s1 }
   0x3   :  { %4514 = sst [smem:[#allocation23_spill]] %s4488_s2 }
   0x4   :  { %4515 = sst [smem:[#allocation24_spill]] %s4489_s3 }
   0x5   :  { %22 = vsyncpa [#allocation7], 0 }
   0x6   :  { %23 = vsyncpa [#allocation10], 0 }
   0x7   :  { %24 = vsyncpa [#allocation8], 0 }
   0x8   :  { %26 = vsyncpa [#allocation8 + $0x1], 0  ;;  %s3851_s24 = smov 0   ;;  %s3853_s25 = smov 0  }
   0x9   :  { %s3855_s26 = smov 0   ;;  %s3857_s27 = smov 0  }
   0xa LB: > { %4516 = sst [smem:[#allocation16_spill]] %s3730_s24  ;;  %s3872_s28 = sadd.s32 4294967295, %s3742_s27   ;;  %s3742_s27 = sphi %s3857_s27, %s4538_s27   ;;  %s3738_s26 = sphi %s3855_s26, %s4540_s26   ;;  %s3734_s25 = sphi %s3853_s25, %s4542_s25   ;;  %s3730_s24 = sphi %s3851_s24, %s4541_s24  }
   0xb   : > { %4517 = sst [smem:[#allocation17_spill]] %s3738_s26  ;;  %s3207_s29 = sadd.s32 4294967294, %s3742_s27  }
   0xc   : > { %s3876_s0 = sadd.s32 1, %s3742_s27   ;;  %s401_s30 = sadd.s32 1, %s3738_s26 }
   0xd   : > { %4518 = sst [smem:[#allocation18_spill]] %s3876_s0  ;;  %s398_s18 = ssub.s32 %s3742_s27, %s3876_s0 }
   0xe   : > { %p411_p0 = scmp.ne.s32.totalorder %s3738_s26, %s3734_s25  ;;  %p399_p1 = scmp.eq.s32.totalorder %s398_s18, 0 }
   0xf   : > { %p412_p2 = scmp.eq.s32.totalorder %s3872_s28, 1  ;;  %p417_p3 = scmp.ne.s32.totalorder %s3734_s25, %s3730_s24 }
  0x10   : > { %p418_p4 = scmp.eq.s32.totalorder %s3207_s29, 1  ;;  %p3208_p7 = scmp.ge.s32.totalorder %s3742_s27, 1 }
  0x11   : > { %s3887_s19 = scalar_select %p399_p1, %s3738_s26, %s401_s30  }
  0x12   : > { %p3889_p5 = por %p412_p2, %p411_p0  ;;  %p3893_p6 = por %p418_p4, %p417_p3 }
  0x13   : > { %4519 = sst [smem:[#allocation19_spill]] %s3887_s19  ;;  %p425_p8 = scmp.lt.s32.totalorder %s3742_s27, 3 }
  0x14   : > { %s4520_s1 = scalar_select %p3889_p5, 1, 0 }
  0x15   : > { %s4521_s20 = scalar_select %p3893_p6, 1, 0 }
  0x16   : > { %p4509_p9 = scmp.eq.s32.totalorder %s3872_s28, 0  ;;  %p3900_p10 = pnand %p3208_p7, %p425_p8 }
  0x17   : > { %4522 = sst [smem:[#allocation20_spill]] %s4521_s20  ;;  %s3744_s22 = smov [#allocation9]  }
  0x18   : > { %s458_s23 = sshll.u32 %s3744_s22, 4  ;;  %p3421_p11 = pneg %p3900_p10  ;;  %s459_s23 = int_to_ptr.vmem [resolvable:$true] %s458_s23 }
  0x19   : > { %s3745_s29 = smov [#allocation6]   ;;  %s3746_s19 = smov [#allocation11]  }
  0x1a   : > { %s441_s30 = sshll.u32 %s3745_s29, 4  ;;  %p3908_p12 = pnand %p4509_p9, %p3421_p11  ;;  %s442_s30 = int_to_ptr.vmem [resolvable:$true] %s441_s30 }
  0x1b   : > { %s469_s26 = sshll.u32 %s3746_s19, 4  ;;  %s3607_s22 = scalar_lea.vmem %s459_s23, 16  ;;  %s3912_s26 = int_to_ptr.vmem [resolvable:$true] %s469_s26 }
  0x1c   : > { %p3598_p13 = pneg %p3908_p12  ;;  %p3608_p0 = scmp.ne.s32.totalorder %s459_s23, %s3607_s22 }
  0x1d   : > { %s3614_s29 = scalar_lea.vmem %s459_s23, 32  ;;  %p3615_p3 = scmp.lt.s32.totalorder %s459_s23, %s459_s23 }
  0x1e   : > { %p3610_p1 = pnand %p3608_p0, %p3598_p13  ;;  %p3616_p4 = scmp.lt.s32.totalorder %s3614_s29, %s3607_s22 }
  0x20   : > { %p3611_p2 = pneg %p3610_p1  ;;  %p3617_p7 = por %p3616_p4, %p3615_p3 }
  0x22   : > { %p3618_p8 = pnand %p3617_p7, %p3611_p2 }
  0x24   : > { %3621 = shalt.err (!%p3618_p8)
}
  0x25   : > { %3427 = dma.hbm_to_vmem [thread:$0]  (!%p3908_p12), %s4491_s5, 16, %s459_s23, [#allocation10]  }
  0x26   : > { %s3633_s20 = scalar_lea.vmem %s442_s30, 16  ;;  %s3640_s24 = scalar_lea.vmem %s442_s30, 32 }
  0x27   : > { %p3634_p11 = scmp.ne.s32.totalorder %s442_s30, %s3633_s20  ;;  %p3641_p1 = scmp.lt.s32.totalorder %s442_s30, %s442_s30 }
  0x28   : > { %p3642_p6 = scmp.lt.s32.totalorder %s3640_s24, %s3633_s20 }
  0x29   : > { %p3636_p9 = pnand %p3634_p11, %p3598_p13 }
  0x2a   : > { %p3643_p5 = por %p3642_p6, %p3641_p1 }
  0x2b   : > { %p3637_p0 = pneg %p3636_p9 }
  0x2d   : > { %p3644_p3 = pnand %p3643_p5, %p3637_p0 }
  0x2f   : > { %3647 = shalt.err (!%p3644_p3)
}
  0x30   : > { %s4525_s2 = sld [smem:[#allocation23_spill]]  ;;  %s3659_s0 = scalar_lea.vmem %s3912_s26, 16 }
  0x31   : > { %p3660_p2 = scmp.ne.s32.totalorder %s3912_s26, %s3659_s0  ;;  %s3666_s24 = scalar_lea.vmem %s3912_s26, 32 }
  0x32   : > { %p3667_p5 = scmp.lt.s32.totalorder %s3912_s26, %s3912_s26  ;;  %p3668_p6 = scmp.lt.s32.totalorder %s3666_s24, %s3659_s0 }
  0x33   : > { %p3662_p9 = pnand %p3660_p2, %p3598_p13 }
  0x34   : > { %p3669_p7 = por %p3668_p6, %p3667_p5 }
  0x35   : > { %p3663_p4 = pneg %p3662_p9 }
  0x36   : > { %3424 = dma.hbm_to_vmem [thread:$0]  (!%p3908_p12), %s4525_s2, 16, %s442_s30, [#allocation7]  }
  0x37   : > { %p3670_p8 = pnand %p3669_p7, %p3663_p4 }
  0x39   : > { %3673 = shalt.err (!%p3670_p8)
}
  0x3a   : > { %3430 = dma.hbm_to_vmem [thread:$0]  (!%p3908_p12), %s4492_s6, 16, %s3912_s26, [#allocation10]  }
  0x3b   : > { %519 = sbr.rel (%p3900_p10) target bundleno = 8530 (0x2152), region = 88  ;;  %p4526_p13 = scmp.eq.s32.totalorder (!%p3900_p10), %s3872_s28, 0 }
  0x40   : > { %3717 = dma.done.wait (%p4526_p13), [#allocation7], 16   ;;  %p4527_p11 = pmov %p4526_p13 }
  0x42   : > { %3719 = vsyncadd (%p4527_p11), [#allocation7], 4294967280  ;;  %p4528_p0 = pmov %p4527_p11 }
  0x44   : > { %3721 = dma.done.wait (%p4528_p0), [#allocation10], 32   ;;  %p4529_p1 = pmov %p4528_p0 }
  0x45   : > { %p578_p3 = scmp.lt.s32.totalorder %s3872_s28, 1  ;;  %vm582_vm0 = vcmask 31744   ;;  %vm584_vm1 = vcmask 29696   ;;  %v3747_v0 = vmov 0.0   ;;  %s4530_s19 = sld [smem:[#allocation21_spill]]  ;;  %vm648_vm2 = vcmask 1043456  }
  0x46   : > { %3723 = vsyncadd (%p4529_p1), [#allocation10], 4294967264  ;;  %583 = vst.msk [vmem:[#allocation2] sm:$0xff] %vm582_vm0, %v3747_v0  ;;  %3303 = vmatprep.subr.mxu0 %v3747_v0  ;;  %3314 = vmatprep.subr.mxu1 %v3747_v0  ;;  %s4531_s24 = sld [smem:[#allocation22_spill]]  ;;  %vm3748_vm3 = vmmov 0   ;;  %s3749_s2 = smov 4   ;;  %v908_v33 = vlaneseq }
  0x47   : > { %585 = vst.msk [vmem:[#allocation2 + $0x8] sm:$0x3f] %vm584_vm1, %v3747_v0  ;;  %s579_s26 = scalar_select %p578_p3, %s3872_s28, 1  ;;  %3311 = vmatprep.mubr.msk.f32.mxu0 %vm3748_vm3, %v3747_v0  ;;  %3316 = vmatprep.mubr.msk.f32.mxu1 %vm3748_vm3, %v3747_v0  ;;  %vm595_vm4 = vcmask 64544   ;;  %vm602_vm5 = vcmask 97344   ;;  %vm609_vm6 = vcmask 130144  }
  0x48   : > { %s3750_s30 = smov 12   ;;  %s3752_s29 = smov 16   ;;  %vm616_vm7 = vcmask 162944   ;;  %vm623_vm8 = vcmask 195744   ;;  %vm630_vm9 = vcmask 228544   ;;  %vm644_vm10 = vcmask 228352  }
  0x49   : > { %s3218_s21 = sshll.u32 %s579_s26, 3  ;;  %s3753_s0 = smov 20   ;;  %v1297_v20 = vld [vmem:[%s4494_s8] sm:$0xf]  ;;  %v3219_v22 = vld [vmem:[#allocation6] ss:$0 sm:$0xff] }
  0x4a   : > { %s4533_s3 = sld [smem:[#allocation24_spill]]  ;;  %vm760_vm11 = vcmask 64512   ;;  %v756_v27 = vld [vmem:[%s4490_s4] sm:$0xff]  ;;  %v3755_v31 = vmov 1966171168   ;;  %v4028_v35 = vshrl.u32 %v908_v33, 7 }
  0x4b   : > { %s581_s22 = scalar_lea.vmem %s4530_s19, %s3218_s21  ;;  %v906_v32 = vunpack.c.l.s4 %v3755_v31  ;;  %v3224_v46 = vld [vmem:[#allocation9] ss:$0 sm:$0xff]  ;;  %v3225_v56 = vld [vmem:[#allocation11] ss:$0 sm:$0xff]  ;;  %vm985_vm14 = vcmask 125952   ;;  %s3759_s23 = smov 112  }
  0x4c   : > { %v586_v1 = vld [vmem:[%s581_s22] sm:$0xff]  ;;  %s4532_s20 = smov %s4531_s24  ;;  %v636_v2 = vld [vmem:[%s4531_s24 + $0x18] sm:$0xf]  ;;  %s3751_s22 = smov 8   ;;  %v4035_v40 = vsub.s32 0, %v4028_v35 }
  0x4d   : > { %587 = vst.msk [vmem:[#allocation2 + $0x3] sm:$0xff] %vm582_vm0, %v586_v1  ;;  %v635_v3 = vld [vmem:[%s4532_s20 + $0x10] sm:$0xff]  ;;  %3304 = vmatpush3.msk.msra.mxu0 %vm648_vm2, %v636_v2  ;;  %v634_v6 = vld [vmem:[%s4532_s20 + $0x8] sm:$0xff]  ;;  %v633_v10 = vld [vmem:[%s4532_s20] sm:$0xff]  ;;  %s3754_s24 = smov 24   ;;  %v907_v34 = vunpack.c.0.s8 %v906_v32  ;;  %s575_s26 = sand.u32 1, %s3734_s25  }
  0x4e   : > { %3305 = vmatprep.subr.mxu0 %v3747_v0  ;;  %s3217_s21 = sshll.u32 %s575_s26, 3  ;;  %p4534_p12 = scmp.ne.s32.totalorder %s4520_s1, 0 }
  0x4f   : > { %3306 = vmatpush3.msra.mxu0 %v635_v3  ;;  %v4031_v36 = vsub.s32 %v907_v34, %v4028_v35  ;;  %s577_s18 = scalar_lea.vmem [#allocation12], %s3217_s21 }
  0x50   : > { %3307 = vmatprep.subr.mxu0 %v3747_v0  ;;  %v755_v21 = vld [vmem:[%s4533_s3] sm:$0xff]  ;;  %s3117_s19 = sshll.u32 %s577_s18, 4  ;;  %s3118_s19 = int_to_ptr.vmem [resolvable:$true] %s3117_s19 }
  0x51   : > { %3308 = vmatpush3.msra.mxu0 %v634_v6  ;;  %3315 = vmatpush3.msra.mxu1 %v755_v21 }
  0x52   : > { %3309 = vmatprep.subr.mxu0 %v3747_v0  ;;  %3319 = vmatprep.subr.mxu1 %v3747_v0 }
  0x53   : > { %3310 = vmatpush3.msra.mxu0 %v633_v10  ;;  %v3756_v10 = vmov 0  }
  0x54   : > { %v590_v4 = vld [vmem:[#allocation2 + $0x1] sm:$0xff]  ;;  %3329 = vmatprep.subr.mxu0 %v3747_v0  ;;  %3490 = vset.pattern.permute.xlu1 %v3756_v10 }
  0x55   : > { %v604_v5 = vld [vmem:[#allocation2 + $0x3] sm:$0xff]  ;;  %592 = vrot.lane.b32.xlu0 %v590_v4, %s3749_s2 }
  0x56   : > { %606 = vrot.lane.b32.xlu1 %v604_v5, %s3750_s30  ;;  %v597_v7 = vld [vmem:[#allocation2 + $0x2] sm:$0xff]  ;;  %s3256_s30 = sshll.u32 %s3872_s28, 7 }
  0x57   : > { %v611_v8 = vld [vmem:[#allocation2 + $0x4] sm:$0xff] }
  0x58   : > { %v588_v9 = vld [vmem:[#allocation2] sm:$0xff] }
  0x59   : > { %589 = vst.msk [vmem:[#allocation3] sm:$0xff] %vm582_vm0, %v588_v9  ;;  %599 = vrot.lane.b32.xlu0 %v597_v7, %s3751_s22  ;;  %v618_v11 = vld [vmem:[#allocation2 + $0x5] sm:$0xff]  ;;  %v759_v7 = vld [vmem:[%s4493_s7] sm:$0xf]  ;;  %v4050_v9 = vsub.s32 1, %v4028_v35 }
  0x5a   : > { %613 = vrot.lane.b32.xlu1 %v611_v8, %s3752_s29  ;;  %v625_v12 = vld [vmem:[#allocation2 + $0x6] sm:$0xff]  ;;  %v1002_v8 = vrot.slane %v759_v7, %v4035_v40 }
  0x5d   : > { %620 = vrot.lane.b32.xlu0 %v618_v11, %s3753_s0  ;;  %v1009_v11 = vrot.slane %v759_v7, %v4050_v9  ;;  %s3104_s0 = scalar_lea.sflag [#allocation8], %s575_s26 }
  0x5e   : > { %627 = vrot.lane.b32.xlu1 %v625_v12, %s3754_s24  ;;  %v4054_v12 = vsub.s32 2, %v4028_v35  ;;  %s3758_s24 = smov 32  }
  0xc7   : > { %v593_v13 = vpop.permute.xlu0 %592 }
  0xc8   : > { %v607_v14 = vpop.permute.xlu1 %606  ;;  %596 = vst.msk [vmem:[#allocation3] sm:$0xff] %vm595_vm4, %v593_v13  ;;  %v1016_v13 = vrot.slane %v759_v7, %v4054_v12 }
  0xcb   : > { %v600_v15 = vpop.permute.xlu0 %599 }
  0xcc   : > { %v614_v16 = vpop.permute.xlu1 %613  ;;  %603 = vst.msk [vmem:[#allocation3] sm:$0xff] %vm602_vm5, %v600_v15 }
  0xcd   : > { %610 = vst.msk [vmem:[#allocation3] sm:$0xff] %vm609_vm6, %v607_v14  ;;  %vm1069_vm6 = vcmask 1041409  }
  0xce   : > { %617 = vst.msk [vmem:[#allocation3] sm:$0xff] %vm616_vm7, %v614_v16  ;;  %vm1071_vm7 = vcmask 1042434  }
  0xcf   : > { %v621_v17 = vpop.permute.xlu0 %620 }
  0xd0   : > { %v628_v18 = vpop.permute.xlu1 %627  ;;  %624 = vst.msk [vmem:[#allocation3] sm:$0xff] %vm623_vm8, %v621_v17  ;;  %vm1073_vm8 = vcmask 1043459  }
  0xd1   : > { %631 = vst.msk [vmem:[#allocation3] sm:$0xff] %vm630_vm9, %v628_v18  ;;  %vm1076_vm9 = vcmask 27648  }
  0xd8   : > { %v632_v19 = vld [vmem:[#allocation3] sm:$0xff] }
  0xd9   : > { %3312 = vmatmul.mubr.msk.f32.vlgmr.msra.gmra.mxu0 %vm644_vm10, %v632_v19 }
  0xda   : > { %3331 = vmatprep.mubr.msk.f32.mxu0 %vm3748_vm3, %v3747_v0  ;;  %3330 = vmatpush3.msk.msra.mxu0 %vm648_vm2, %v1297_v20 }
  0xdb   : > { %3339 = vmatprep.subr.mxu0 %v3747_v0 }
 0x199   : > { %v718_v23 = vpop.f32.mrf.mxu0 }
 0x19a   : > { %v719_v24 = vadd.f32 %v3219_v22, %v718_v23  ;;  %v4060_v22 = vsub.s32 3, %v4028_v35 }
 0x19b   : > { %v3313_v25 = vpop.f32.mrf.mxu0 }
 0x19c   : > { %v4004_v26 = vmax.f32 %v719_v24, 0.0  ;;  %v1023_v23 = vrot.slane %v759_v7, %v4060_v22 }
 0x19e   : > { %2120 = vst.msk [vmem:[#allocation4] sm:$0xff] %vm582_vm0, %v4004_v26  ;;  %723 = vxpose.xlu0.b32.start.end [1/1] (short) (narrow) %v4004_v26, 8  ;;  %3332 = vmatmul.mubr.msk.f32.vlgmr.msra.gmra.mxu0 %vm582_vm0, %v4004_v26 }
 0x19f   : > { %3340 = vmatpush3.msra.mxu0 %v4004_v26  ;;  %3341 = vmatprep.mubr.msk.f32.mxu0 %vm3748_vm3, %v3747_v0 }
 0x1a0   : > { %3351 = vmatprep.subr.mxu0 %v3747_v0 }
 0x1c7   : > { %3491 = vset.pattern.permute.xlu0 %v3756_v10 }
 0x21a   : > { %v739_v28 = vpop.trf.xlu0 }
 0x21b   : > { %3317 = vmatmul.mubr.msk.f32.vlgmr.msra.gmra.mxu1 %vm760_vm11, %v739_v28 }
 0x21c   : > { %3320 = vmatpush3.msra.mxu1 %v756_v27  ;;  %3321 = vmatprep.mubr.msk.f32.mxu1 %vm3748_vm3, %v3747_v0 }
 0x21d   : > { %3324 = vmatprep.subr.mxu1 %v3747_v0 }
 0x21f   : > { %3322 = vmatmul.mubr.msk.f32.vlgmr.msra.gmra.mxu1 %vm760_vm11, %v739_v28 }
 0x220   : > { %3326 = vmatprep.mubr.msk.f32.mxu1 %vm3748_vm3, %v3747_v0 }
 0x25e   : > { %v4025_v29 = vpop.f32.mrf.mxu0 }
 0x260   : > { %v3333_v30 = vpop.f32.mrf.mxu0 }
 0x2db   : > { %v830_v37 = vpop.f32.mrf.mxu1 }
 0x2dc   : > { %v911_v38 = vrot.slane %v830_v37, %v4031_v36 }
 0x2dd   : > { %v3318_v39 = vpop.f32.mrf.mxu1 }
 0x2de   : > { %v912_v41 = vcombine.high %v911_v38, %v911_v38  ;;  %v919_v42 = vrot.slane %v911_v38, %v4031_v36 }
 0x2df   : > { %v900_v43 = vpop.f32.mrf.mxu1 }
 0x2e0   : > { %v926_v44 = vrot.slane %v912_v41, %v4031_v36  ;;  %v932_v45 = vrot.slane %v919_v42, %v4035_v40  ;;  %v927_v14 = vcombine.high %v919_v42, %v919_v42  ;;  %v1052_v42 = vand.u32 127, %v908_v33 }
 0x2e1   : > { %v3323_v47 = vpop.f32.mrf.mxu1 }
 0x2e2   : > { %v928_v48 = vcombine.high %v926_v44, %v926_v44  ;;  %v936_v49 = vrot.slane %v926_v44, %v4035_v40  ;;  %v949_v50 = vadd.f32 %v932_v45, %v900_v43  ;;  %v940_v15 = vrot.slane %v927_v14, %v4035_v40 }
 0x2e3   : > { %v4065_v45 = vsub.s32 %v1052_v42, %v4028_v35 }
 0x2e4   : > { %v944_v51 = vrot.slane %v928_v48, %v4035_v40  ;;  %v950_v52 = vadd.f32 %v936_v49, %v900_v43  ;;  %v959_v53 = vadd.f32 %v3224_v46, %v949_v50  ;;  %v951_v16 = vadd.f32 %v940_v15, %v900_v43 }
 0x2e6   : > { %v952_v54 = vadd.f32 %v944_v51, %v900_v43  ;;  %v960_v55 = vadd.f32 %v3224_v46, %v950_v52  ;;  %vm963_vm12 = vcmp.gt.f32.partialorder %v959_v53, 0.0  ;;  %v967_v57 = vmul.f32 0.2, %v959_v53 }
 0x2e7   : > { %v961_v17 = vadd.f32 %v3224_v46, %v951_v16 }
 0x2e8   : > { %v962_v58 = vadd.f32 %v3224_v46, %v952_v54  ;;  %vm964_vm13 = vcmp.gt.f32.partialorder %v960_v55, 0.0  ;;  %v968_v59 = vmul.f32 0.2, %v960_v55  ;;  %v971_v60 = vsel %vm963_vm12, %v959_v53, %v967_v57 }
 0x2e9   : > { %v981_v61 = vmul.f32 %v3225_v56, %v971_v60  ;;  %v969_v18 = vmul.f32 0.2, %v961_v17  ;;  %vm965_vm1 = vcmp.gt.f32.partialorder %v961_v17, 0.0 }
 0x2ea   : > { %v972_v62 = vsel %vm964_vm13, %v960_v55, %v968_v59  ;;  %vm966_vm15 = vcmp.gt.f32.partialorder %v962_v58, 0.0  ;;  %v970_v63 = vmul.f32 0.2, %v962_v58 }
 0x2eb   : > { %v982_v1 = vmul.f32 %v3225_v56, %v972_v62  ;;  %v986_v2 = vsel %vm985_vm14, %v981_v61, 0.0  ;;  %v973_v19 = vsel %vm965_vm1, %v961_v17, %v969_v18 }
 0x2ec   : > { %v974_v3 = vsel %vm966_vm15, %v962_v58, %v970_v63  ;;  %987 = vadd.xlane.f32.xlu1 %v986_v2  ;;  %v983_v20 = vmul.f32 %v3225_v56, %v973_v19 }
 0x2ed   : > { %v989_v4 = vsel %vm985_vm14, %v982_v1, 0.0  ;;  %v984_v5 = vmul.f32 %v3225_v56, %v974_v3 }
 0x2ee   : > { %990 = vadd.xlane.f32.xlu0 %v989_v4  ;;  %v992_v21 = vsel %vm985_vm14, %v983_v20, 0.0 }
 0x2ef   : > { %v995_v6 = vsel %vm985_vm14, %v984_v5, 0.0 }
 0x2fd   : > { %1004 = vbcast.lane.b32.xlu1 %v1002_v8, 256 }
 0x301   : > { %1011 = vbcast.lane.b32.xlu1 %v1009_v11, 256 }
 0x305   : > { %1018 = vbcast.lane.b32.xlu1 %v1016_v13, 256 }
 0x329   : > { %993 = vadd.xlane.f32.xlu1 %v992_v21 }
 0x32d   : > { %996 = vadd.xlane.f32.xlu1 %v995_v6 }
 0x33e   : > { %1025 = vbcast.lane.b32.xlu1 %v1023_v23, 256 }
 0x375   : > { %v988_v24 = vpop.xlane.xlu1 %987 }
 0x377   : > { %v991_v28 = vpop.xlane.xlu0 %990 }
 0x379   : > { %v1005_v25 = vpop.permute.xlu1 %1004 }
 0x37a   : > { %v1031_v27 = vadd.f32 %v1005_v25, %v988_v24 }
 0x37c   : > { %1040 = vperm.xlu1 %3490, %v1031_v27  }
 0x37d   : > { %v1012_v30 = vpop.permute.xlu1 %1011 }
 0x37e   : > { %v1032_v31 = vadd.f32 %v1012_v30, %v991_v28 }
 0x380   : > { %1043 = vperm.xlu0 %3491, %v1032_v31  }
 0x381   : > { %v1019_v32 = vpop.permute.xlu1 %1018 }
 0x3b2   : > { %v994_v34 = vpop.xlane.xlu1 %993 }
 0x3b3   : > { %v1033_v37 = vadd.f32 %v1019_v32, %v994_v34 }
 0x3b5   : > { %1046 = vperm.xlu1 %3490, %v1033_v37  }
 0x3b6   : > { %v997_v38 = vpop.xlane.xlu1 %996 }
 0x3ba   : > { %v1026_v39 = vpop.permute.xlu1 %1025 }
 0x3bb   : > { %v1034_v41 = vadd.f32 %v1026_v39, %v997_v38 }
 0x3bd   : > { %1049 = vperm.xlu1 %3490, %v1034_v41  }
 0x3f7   : > { %v1041_v43 = vpop.permute.xlu1 %1040 }
 0x3f8   : > { %v1056_v49 = vrot.slane %v1041_v43, %v4065_v45  ;;  %v4094_v43 = vld [vmem:[%s4498_s12] sm:$0xff] }
 0x3fb   : > { %v1044_v44 = vpop.permute.xlu0 %1043 }
 0x3fc   : > { %v1060_v47 = vrot.slane %v1044_v44, %v4065_v45  ;;  %v4097_v44 = vsub.s32 4, %v4028_v35 }
 0x3fe   : > { %v1070_v51 = vsel %vm1069_vm6, %v1060_v47, %v1056_v49  ;;  %v1626_v47 = vrot.slane %v4094_v43, %v4035_v40  ;;  %v1654_v49 = vrot.slane %v4094_v43, %v4097_v44 }
 0x430   : > { %v1047_v46 = vpop.permute.xlu1 %1046 }
 0x431   : > { %v1064_v48 = vrot.slane %v1047_v46, %v4065_v45  ;;  %v1633_v46 = vrot.slane %v4094_v43, %v4050_v9 }
 0x433   : > { %v1072_v52 = vsel %vm1071_vm7, %v1064_v48, %v1070_v51  ;;  %v1640_v48 = vrot.slane %v4094_v43, %v4054_v12  ;;  %v4110_v51 = vsub.s32 5, %v4028_v35 }
 0x438   : > { %v1050_v50 = vpop.permute.xlu1 %1049 }
 0x439   : > { %v1068_v33 = vrot.slane %v1050_v50, %v4065_v45  ;;  %v1647_v50 = vrot.slane %v4094_v43, %v4060_v22 }
 0x43b   : > { %v1074_v53 = vsel %vm1073_vm8, %v1068_v33, %v1072_v52  ;;  %v1661_v33 = vrot.slane %v4094_v43, %v4110_v51 }
 0x43c   : > { %v1077_v54 = vsel %vm1076_vm9, %v1074_v53, -inf }
 0x43d   : > { %1078 = vmax.xlane.f32.xlu1 %v1077_v54 }
 0x4c6   : > { %v1079_v55 = vpop.xlane.xlu1 %1078 }
 0x4c7   : > { %v1084_v56 = vrot.slane %v1079_v55, %v4035_v40  ;;  %v1088_v57 = vrot.slane %v1079_v55, %v4050_v9  ;;  %v1092_v58 = vrot.slane %v1079_v55, %v4054_v12  ;;  %v1096_v59 = vrot.slane %v1079_v55, %v4060_v22 }
 0x4c9   : > { %v1101_v60 = vsub.f32 %v1031_v27, %v1084_v56  ;;  %v1102_v61 = vsub.f32 %v1032_v31, %v1088_v57  ;;  %v1103_v62 = vsub.f32 %v1033_v37, %v1092_v58  ;;  %v1104_v2 = vsub.f32 %v1034_v41, %v1096_v59 }
 0x4cb   : > { %v1105_v63 = vmul.f32 1.442695, %v1101_v60  ;;  %v1107_v1 = vmul.f32 1.442695, %v1102_v61  ;;  %v1109_v3 = vmul.f32 1.442695, %v1103_v62 }
 0x4cc   : > { %v1111_v4 = vmul.f32 1.442695, %v1104_v2 }
 0x4cd   : > { %3492 = vpow2.f32 %v1105_v63  ;;  %v1298_v63 = vld [vmem:[%s4495_s9] sm:$0xf] }
 0x4ce   : > { %3494 = vpow2.f32 %v1107_v1  ;;  %v1456_v1 = vrot.slane %v4025_v29, %v4031_v36 }
 0x4cf   : > { %3496 = vpow2.f32 %v1109_v3  ;;  %v1449_v3 = vcombine.high %v4025_v29, %v4025_v29 }
 0x4d0   : > { %3498 = vpow2.f32 %v1111_v4  ;;  %v1464_v2 = vcombine.high %v1456_v1, %v1456_v1  ;;  %v1472_v4 = vrot.slane %v1456_v1, %v4031_v36 }
 0x4da   : > { %v3493_v5 = vpop.eup %3492 }
 0x4db   : > { %v3495_v6 = vpop.eup %3494  ;;  %1118 = vperm.xlu0 %3491, %v3493_v5  }
 0x4dc   : > { %1121 = vperm.xlu1 %3490, %v3495_v6   ;;  %v3497_v7 = vpop.eup %3496 }
 0x4dd   : > { %v3499_v8 = vpop.eup %3498 }
 0x4df   : > { %1124 = vperm.xlu0 %3491, %v3497_v7  }
 0x4e3   : > { %1127 = vperm.xlu0 %3491, %v3499_v8  }
 0x556   : > { %v1119_v10 = vpop.permute.xlu0 %1118 }
 0x557   : > { %v1122_v11 = vpop.permute.xlu1 %1121  ;;  %v1132_v15 = vrot.slane %v1119_v10, %v4065_v45 }
 0x558   : > { %v1136_v14 = vrot.slane %v1122_v11, %v4065_v45 }
 0x55a   : > { %v1125_v13 = vpop.permute.xlu0 %1124  ;;  %v1145_v18 = vsel %vm1069_vm6, %v1136_v14, %v1132_v15  ;;  %v1501_v14 = vrot.slane %v1472_v4, %v4035_v40 }
 0x55b   : > { %v1140_v16 = vrot.slane %v1125_v13, %v4065_v45 }
 0x55d   : > { %v1146_v20 = vsel %vm1071_vm7, %v1140_v16, %v1145_v18 }
 0x55e   : > { %v1128_v17 = vpop.permute.xlu0 %1127 }
 0x55f   : > { %v1144_v19 = vrot.slane %v1128_v17, %v4065_v45 }
 0x561   : > { %v1147_v21 = vsel %vm1073_vm8, %v1144_v19, %v1146_v20  ;;  %v3233_v20 = vld [vmem:[%s4496_s10] ss:$0 sm:$0xff] }
 0x562   : > { %v1149_v23 = vsel %vm1076_vm9, %v1147_v21, 0.0 }
 0x563   : > { %1150 = vadd.xlane.f32.xlu0 %v1149_v23 }
 0x579   : > { %1628 = vbcast.lane.b32.xlu0 %v1626_v47, 256 }
 0x57d   : > { %1656 = vbcast.lane.b32.xlu0 %v1654_v49, 256 }
 0x5ec   : > { %v1151_v24 = vpop.xlane.xlu0 %1150 }
 0x5ed   : > { %v1156_v25 = vrot.slane %v1151_v24, %v4035_v40  ;;  %v1160_v27 = vrot.slane %v1151_v24, %v4050_v9  ;;  %v1164_v28 = vrot.slane %v1151_v24, %v4054_v12  ;;  %v1168_v30 = vrot.slane %v1151_v24, %v4060_v22 }
 0x5ef   : > { %3500 = vrcp.f32 %v1156_v25 }
 0x5f0   : > { %3502 = vrcp.f32 %v1160_v27 }
 0x5f1   : > { %3504 = vrcp.f32 %v1164_v28 }
 0x5f2   : > { %3506 = vrcp.f32 %v1168_v30 }
 0x5fc   : > { %v3501_v31 = vpop.eup %3500 }
 0x5fd   : > { %v1174_v32 = vmul.f32 %v3501_v31, %v3493_v5  ;;  %v3503_v34 = vpop.eup %3502  ;;  %v1486_v5 = vrot.slane %v1464_v2, %v4031_v36 }
 0x5fe   : > { %v1176_v37 = vmul.f32 %v3503_v34, %v3495_v6  ;;  %v3505_v38 = vpop.eup %3504  ;;  %v1463_v6 = vrot.slane %v1449_v3, %v4031_v36 }
 0x5ff   : > { %1186 = vperm.xlu1 %3490, %v1174_v32   ;;  %v1178_v39 = vmul.f32 %v3505_v38, %v3497_v7  ;;  %v3507_v41 = vpop.eup %3506  ;;  %v1494_v7 = vcombine.high %v1472_v4, %v1472_v4  ;;  %v1505_v15 = vrot.slane %v1486_v5, %v4035_v40  ;;  %v3234_v38 = vld [vmem:[%s4497_s11] ss:$0 sm:$0xff] }
 0x600   : > { %v1180_v42 = vmul.f32 %v3507_v41, %v3499_v8  ;;  %v1496_v8 = vcombine.high %v1486_v5, %v1486_v5  ;;  %v1465_v10 = vcombine.high %v1463_v6, %v1463_v6 }
 0x601   : > { %v1509_v29 = vrot.slane %v1494_v7, %v4035_v40 }
 0x602   : > { %v1513_v16 = vrot.slane %v1496_v8, %v4035_v40  ;;  %v1493_v17 = vrot.slane %v1465_v10, %v4031_v36 }
 0x603   : > { %1189 = vperm.xlu1 %3490, %v1176_v37  }
 0x607   : > { %1192 = vperm.xlu1 %3490, %v1178_v39  }
 0x60b   : > { %1195 = vperm.xlu1 %3490, %v1180_v42  }
 0x60f   : > { %1635 = vbcast.lane.b32.xlu1 %v1633_v46, 256 }
 0x613   : > { %1642 = vbcast.lane.b32.xlu1 %v1640_v48, 256 }
 0x617   : > { %1649 = vbcast.lane.b32.xlu1 %v1647_v50, 256 }
 0x61b   : > { %1663 = vbcast.lane.b32.xlu1 %v1661_v33, 256 }
 0x67a   : > { %v1187_v52 = vpop.permute.xlu1 %1186 }
 0x67b   : > { %v1200_v57 = vrot.slane %v1187_v52, %v4065_v45 }
 0x67e   : > { %v1190_v53 = vpop.permute.xlu1 %1189 }
 0x67f   : > { %v1204_v55 = vrot.slane %v1190_v53, %v4065_v45 }
 0x681   : > { %v1213_v59 = vsel %vm1069_vm6, %v1204_v55, %v1200_v57 }
 0x682   : > { %v1193_v54 = vpop.permute.xlu1 %1192 }
 0x683   : > { %v1208_v56 = vrot.slane %v1193_v54, %v4065_v45  ;;  %v1497_v54 = vcombine.high %v1493_v17, %v1493_v17 }
 0x685   : > { %v1214_v61 = vsel %vm1071_vm7, %v1208_v56, %v1213_v59 }
 0x686   : > { %v1196_v58 = vpop.permute.xlu1 %1195 }
 0x687   : > { %v1212_v60 = vrot.slane %v1196_v58, %v4065_v45 }
 0x689   : > { %v1215_v62 = vsel %vm1073_vm8, %v1212_v60, %v1214_v61 }
 0x68a   : > { %3325 = vmatpush3.xpose.msk.msra.mxu1 %vm582_vm0, %v1215_v62 }
 0x68b   : > { %3334 = vmatprep.subr.mxu1 %v3747_v0 }
 0x68d   : > { %3327 = vmatmul.mubr.msk.f32.vlgmr.msra.gmra.mxu1 %vm582_vm0, %v4004_v26 }
 0x68e   : > { %3335 = vmatpush3.msk.msra.mxu1 %vm648_vm2, %v1298_v63  ;;  %3336 = vmatprep.mubr.msk.f32.mxu1 %vm3748_vm3, %v3747_v0  ;;  %v1529_v63 = vrot.slane %v1497_v54, %v4035_v40 }
 0x68f   : > { %3344 = vmatprep.subr.mxu1 %v3747_v0 }
 0x691   : > { %3337 = vmatmul.mubr.msk.f32.vlgmr.msra.gmra.mxu1 %vm582_vm0, %v4004_v26  ;;  %v1479_v26 = vrot.slane %v1463_v6, %v4031_v36  ;;  %v1521_v36 = vrot.slane %v1493_v17, %v4035_v40 }
 0x692   : > { %3348 = vmatprep.mubr.msk.f32.mxu1 %vm3748_vm3, %v3747_v0 }
 0x693   : > { %v1517_v18 = vrot.slane %v1479_v26, %v4035_v40  ;;  %v1495_v37 = vcombine.high %v1479_v26, %v1479_v26 }
 0x695   : > { %v1525_v55 = vrot.slane %v1495_v37, %v4035_v40 }
 0x74d   : > { %v4144_v11 = vpop.f32.mrf.mxu1 }
 0x74f   : > { %v3328_v13 = vpop.f32.mrf.mxu1 }
 0x751   : > { %v1444_v19 = vpop.f32.mrf.mxu1 }
 0x752   : > { %v1538_v21 = vadd.f32 %v1501_v14, %v1444_v19  ;;  %v1539_v23 = vadd.f32 %v1505_v15, %v1444_v19  ;;  %v1540_v24 = vadd.f32 %v1509_v29, %v1444_v19  ;;  %v1541_v25 = vadd.f32 %v1513_v16, %v1444_v19 }
 0x753   : > { %v3338_v27 = vpop.f32.mrf.mxu1  ;;  %v1542_v28 = vadd.f32 %v1517_v18, %v1444_v19  ;;  %v1543_v46 = vadd.f32 %v1521_v36, %v1444_v19  ;;  %v1544_v62 = vadd.f32 %v1525_v55, %v1444_v19  ;;  %v1545_v6 = vadd.f32 %v1529_v63, %v1444_v19 }
 0x754   : > { %v1552_v30 = vadd.f32 %v3233_v20, %v1538_v21  ;;  %v1553_v31 = vadd.f32 %v3233_v20, %v1539_v23  ;;  %v1554_v32 = vadd.f32 %v3233_v20, %v1540_v24  ;;  %v1555_v34 = vadd.f32 %v3233_v20, %v1541_v25 }
 0x755   : > { %v1556_v50 = vadd.f32 %v3233_v20, %v1542_v28  ;;  %v1557_v61 = vadd.f32 %v3233_v20, %v1543_v46  ;;  %v1558_v5 = vadd.f32 %v3233_v20, %v1544_v62  ;;  %v1559_v13 = vadd.f32 %v3233_v20, %v1545_v6 }
 0x756   : > { %vm1560_vm0 = vcmp.gt.f32.partialorder %v1552_v30, 0.0  ;;  %v1568_v39 = vmul.f32 0.2, %v1552_v30  ;;  %vm1561_vm10 = vcmp.gt.f32.partialorder %v1553_v31, 0.0  ;;  %v1569_v41 = vmul.f32 0.2, %v1553_v31 }
 0x757   : > { %vm1562_vm12 = vcmp.gt.f32.partialorder %v1554_v32, 0.0  ;;  %v1570_v42 = vmul.f32 0.2, %v1554_v32  ;;  %v1571_v49 = vmul.f32 0.2, %v1555_v34  ;;  %vm1563_vm13 = vcmp.gt.f32.partialorder %v1555_v34, 0.0 }
 0x758   : > { %v1576_v47 = vsel %vm1560_vm0, %v1552_v30, %v1568_v39  ;;  %v1577_v48 = vsel %vm1561_vm10, %v1553_v31, %v1569_v41  ;;  %v1572_v60 = vmul.f32 0.2, %v1556_v50  ;;  %vm1564_vm14 = vcmp.gt.f32.partialorder %v1556_v50, 0.0  ;;  %v1636_v30 = vpop.permute.xlu1 %1635 }
 0x759   : > { %v1590_v33 = vmul.f32 %v3234_v38, %v1576_v47  ;;  %v1591_v52 = vmul.f32 %v3234_v38, %v1577_v48  ;;  %v1578_v53 = vsel %vm1562_vm12, %v1554_v32, %v1570_v42  ;;  %v1579_v59 = vsel %vm1563_vm13, %v1555_v34, %v1571_v49  ;;  %v1629_v32 = vpop.permute.xlu0 %1628 }
 0x75a   : > { %v1592_v58 = vmul.f32 %v3234_v38, %v1578_v53  ;;  %v1593_v2 = vmul.f32 %v3234_v38, %v1579_v59  ;;  %v1580_v3 = vsel %vm1564_vm14, %v1556_v50, %v1572_v60  ;;  %v1573_v4 = vmul.f32 0.2, %v1557_v61 }
 0x75b   : > { %v1598_v56 = vsel %vm760_vm11, %v1590_v33, 0.0  ;;  %v1601_v57 = vsel %vm760_vm11, %v1591_v52, 0.0  ;;  %vm1565_vm15 = vcmp.gt.f32.partialorder %v1557_v61, 0.0  ;;  %v1594_v8 = vmul.f32 %v3234_v38, %v1580_v3 }
 0x75c   : > { %1599 = vadd.xlane.f32.xlu1 %v1598_v56  ;;  %1602 = vadd.xlane.f32.xlu0 %v1601_v57  ;;  %v1604_v1 = vsel %vm760_vm11, %v1592_v58, 0.0  ;;  %v1607_v7 = vsel %vm760_vm11, %v1593_v2, 0.0  ;;  %v1581_v10 = vsel %vm1565_vm15, %v1557_v61, %v1573_v4  ;;  %v1574_v26 = vmul.f32 0.2, %v1558_v5  ;;  %v1643_v31 = vpop.permute.xlu1 %1642 }
 0x75d   : > { %vm1566_vm1 = vcmp.gt.f32.partialorder %v1558_v5, 0.0  ;;  %v4166_v14 = vsub.s32 7, %v4028_v35  ;;  %v1610_v15 = vsel %vm760_vm11, %v1594_v8, 0.0  ;;  %v1595_v29 = vmul.f32 %v3234_v38, %v1581_v10  ;;  %v1657_v37 = vpop.permute.xlu0 %1656 }
 0x75e   : > { %v1582_v16 = vsel %vm1566_vm1, %v1558_v5, %v1574_v26  ;;  %v1575_v17 = vmul.f32 0.2, %v1559_v13  ;;  %vm1567_vm9 = vcmp.gt.f32.partialorder %v1559_v13, 0.0  ;;  %v4175_v27 = vsub.s32 6, %v4028_v35 }
 0x75f   : > { %v1675_v18 = vrot.slane %v4094_v43, %v4166_v14  ;;  %v1613_v19 = vsel %vm760_vm11, %v1595_v29, 0.0  ;;  %v1596_v21 = vmul.f32 %v3234_v38, %v1582_v16  ;;  %vm1762_vm0 = vcmask 1044484  }
 0x760   : > { %1605 = vadd.xlane.f32.xlu0 %v1604_v1  ;;  %v1583_v23 = vsel %vm1567_vm9, %v1559_v13, %v1575_v17  ;;  %v1668_v28 = vrot.slane %v4094_v43, %v4175_v27  ;;  %v1650_v34 = vpop.permute.xlu1 %1649  ;;  %vm1764_vm10 = vcmask 1045509   ;;  %vm1766_vm12 = vcmask 1046534  }
 0x761   : > { %v1616_v20 = vsel %vm760_vm11, %v1596_v21, 0.0  ;;  %v1597_v24 = vmul.f32 %v3234_v38, %v1583_v23  ;;  %vm1768_vm13 = vcmask 1047559   ;;  %vm2988_vm14 = vcmask 129030  }
 0x762   : > { %vm3099_vm15 = vcmask 130055  }
 0x763   : > { %v1619_v25 = vsel %vm760_vm11, %v1597_v24, 0.0 }
 0x764   : > { %1608 = vadd.xlane.f32.xlu0 %v1607_v7  ;;  %v1664_v36 = vpop.permute.xlu1 %1663 }
 0x768   : > { %1611 = vadd.xlane.f32.xlu0 %v1610_v15 }
 0x76c   : > { %1614 = vadd.xlane.f32.xlu0 %v1613_v19 }
 0x76d   : > { %1677 = vbcast.lane.b32.xlu1 %v1675_v18, 256 }
 0x770   : > { %1617 = vadd.xlane.f32.xlu0 %v1616_v20 }
 0x774   : > { %1620 = vadd.xlane.f32.xlu0 %v1619_v25 }
 0x78a   : > { %1670 = vbcast.lane.b32.xlu0 %v1668_v28, 256 }
 0x7e5   : > { %v1600_v39 = vpop.xlane.xlu1 %1599  ;;  %v1603_v41 = vpop.xlane.xlu0 %1602 }
 0x7e6   : > { %v1687_v38 = vadd.f32 %v1629_v32, %v1600_v39  ;;  %v1688_v42 = vadd.f32 %v1636_v30, %v1603_v41 }
 0x7e8   : > { %1707 = vperm.xlu1 %3490, %v1688_v42   ;;  %1704 = vperm.xlu0 %3491, %v1687_v38  }
 0x7e9   : > { %v1606_v46 = vpop.xlane.xlu0 %1605  ;;  %v1678_v53 = vpop.permute.xlu1 %1677 }
 0x7ea   : > { %v1689_v47 = vadd.f32 %v1643_v31, %v1606_v46 }
 0x7ec   : > { %1710 = vperm.xlu0 %3491, %v1689_v47  }
 0x7ed   : > { %v1609_v35 = vpop.xlane.xlu0 %1608 }
 0x7ee   : > { %v1690_v48 = vadd.f32 %v1650_v34, %v1609_v35 }
 0x7f0   : > { %1713 = vperm.xlu1 %3490, %v1690_v48  }
 0x7f1   : > { %v1612_v43 = vpop.xlane.xlu0 %1611 }
 0x7f2   : > { %v1691_v49 = vadd.f32 %v1657_v37, %v1612_v43 }
 0x7f4   : > { %1716 = vperm.xlu0 %3491, %v1691_v49  }
 0x7f5   : > { %v1615_v50 = vpop.xlane.xlu0 %1614 }
 0x7f6   : > { %v4179_v33 = vadd.f32 %v1664_v36, %v1615_v50 }
 0x7f8   : > { %1719 = vperm.xlu1 %3490, %v4179_v33  }
 0x7f9   : > { %v1618_v52 = vpop.xlane.xlu0 %1617 }
 0x7fd   : > { %v1621_v54 = vpop.xlane.xlu0 %1620 }
 0x7fe   : > { %v1694_v55 = vadd.f32 %v1678_v53, %v1621_v54 }
 0x800   : > { %1725 = vperm.xlu1 %3490, %v1694_v55  }
 0x801   : > { %v1671_v56 = vpop.permute.xlu0 %1670 }
 0x802   : > { %v1693_v57 = vadd.f32 %v1671_v56, %v1618_v52 }
 0x804   : > { %1722 = vperm.xlu0 %3491, %v1693_v57  }
 0x863   : > { %v1705_v58 = vpop.permute.xlu0 %1704  ;;  %v1708_v59 = vpop.permute.xlu1 %1707 }
 0x864   : > { %v1734_v62 = vrot.slane %v1708_v59, %v4065_v45  ;;  %v1730_v63 = vrot.slane %v1705_v58, %v4065_v45 }
 0x866   : > { %v1759_v6 = vsel %vm1069_vm6, %v1734_v62, %v1730_v63 }
 0x867   : > { %v1711_v60 = vpop.permute.xlu0 %1710 }
 0x868   : > { %v1738_v2 = vrot.slane %v1711_v60, %v4065_v45 }
 0x86a   : > { %v1760_v8 = vsel %vm1071_vm7, %v1738_v2, %v1759_v6 }
 0x86b   : > { %v1714_v61 = vpop.permute.xlu1 %1713 }
 0x86c   : > { %v1742_v4 = vrot.slane %v1714_v61, %v4065_v45 }
 0x86e   : > { %v1761_v26 = vsel %vm1073_vm8, %v1742_v4, %v1760_v8 }
 0x86f   : > { %v1717_v1 = vpop.permute.xlu0 %1716 }
 0x870   : > { %v1746_v5 = vrot.slane %v1717_v1, %v4065_v45 }
 0x872   : > { %v1763_v15 = vsel %vm1762_vm0, %v1746_v5, %v1761_v26 }
 0x873   : > { %v1720_v3 = vpop.permute.xlu1 %1719 }
 0x874   : > { %v1750_v7 = vrot.slane %v1720_v3, %v4065_v45 }
 0x876   : > { %v1765_v16 = vsel %vm1764_vm10, %v1750_v7, %v1763_v15 }
 0x87b   : > { %v1726_v10 = vpop.permute.xlu1 %1725 }
 0x87c   : > { %v1758_v17 = vrot.slane %v1726_v10, %v4065_v45 }
 0x87f   : > { %v1723_v13 = vpop.permute.xlu0 %1722 }
 0x880   : > { %v1754_v29 = vrot.slane %v1723_v13, %v4065_v45 }
 0x882   : > { %v1767_v18 = vsel %vm1766_vm12, %v1754_v29, %v1765_v16 }
 0x883   : > { %v1769_v19 = vsel %vm1768_vm13, %v1758_v17, %v1767_v18 }
 0x884   : > { %v1771_v21 = vsel %vm760_vm11, %v1769_v19, -inf }
 0x885   : > { %1772 = vmax.xlane.f32.xlu0 %v1771_v21 }
 0x90e   : > { %v1773_v23 = vpop.xlane.xlu0 %1772 }
 0x90f   : > { %v1778_v20 = vrot.slane %v1773_v23, %v4035_v40  ;;  %v1782_v24 = vrot.slane %v1773_v23, %v4050_v9  ;;  %v1806_v25 = vrot.slane %v1773_v23, %v4166_v14  ;;  %v1786_v28 = vrot.slane %v1773_v23, %v4054_v12 }
 0x910   : > { %v1790_v37 = vrot.slane %v1773_v23, %v4060_v22  ;;  %v1794_v46 = vrot.slane %v1773_v23, %v4097_v44  ;;  %v1798_v50 = vrot.slane %v1773_v23, %v4110_v51 }
 0x911   : > { %v1815_v30 = vsub.f32 %v1687_v38, %v1778_v20  ;;  %v1816_v31 = vsub.f32 %v1688_v42, %v1782_v24  ;;  %v1822_v34 = vsub.f32 %v1694_v55, %v1806_v25  ;;  %v1817_v36 = vsub.f32 %v1689_v47, %v1786_v28 }
 0x912   : > { %v1818_v35 = vsub.f32 %v1690_v48, %v1790_v37  ;;  %v1819_v52 = vsub.f32 %v1691_v49, %v1794_v46  ;;  %v1802_v42 = vrot.slane %v1773_v23, %v4175_v27  ;;  %v1820_v53 = vsub.f32 %v4179_v33, %v1798_v50 }
 0x913   : > { %v1823_v32 = vmul.f32 1.442695, %v1815_v30  ;;  %v1825_v39 = vmul.f32 1.442695, %v1816_v31  ;;  %v1837_v41 = vmul.f32 1.442695, %v1822_v34 }
 0x914   : > { %v1827_v43 = vmul.f32 1.442695, %v1817_v36  ;;  %v1829_v38 = vmul.f32 1.442695, %v1818_v35  ;;  %v1831_v47 = vmul.f32 1.442695, %v1819_v52  ;;  %v1821_v55 = vsub.f32 %v1693_v57, %v1802_v42 }
 0x915   : > { %3508 = vpow2.f32 %v1823_v32  ;;  %v1833_v48 = vmul.f32 1.442695, %v1820_v53  ;;  %v3228_v37 = vmul.f32 -1.442695, %v4144_v11 }
 0x916   : > { %3510 = vpow2.f32 %v1825_v39  ;;  %v1835_v58 = vmul.f32 1.442695, %v1821_v55 }
 0x917   : > { %3512 = vpow2.f32 %v1837_v41 }
 0x918   : > { %3514 = vpow2.f32 %v1827_v43 }
 0x919   : > { %3516 = vpow2.f32 %v1829_v38 }
 0x91a   : > { %3518 = vpow2.f32 %v1831_v47 }
 0x91b   : > { %3520 = vpow2.f32 %v1833_v48 }
 0x91c   : > { %3522 = vpow2.f32 %v1835_v58 }
 0x922   : > { %v4207_v54 = vpop.eup %3508 }
 0x923   : > { %1848 = vperm.xlu1 %3490, %v4207_v54   ;;  %v4210_v56 = vpop.eup %3510 }
 0x924   : > { %v4213_v49 = vpop.eup %3512 }
 0x925   : > { %v4215_v59 = vpop.eup %3514  ;;  %1869 = vperm.xlu0 %3491, %v4213_v49  }
 0x926   : > { %v4219_v33 = vpop.eup %3516 }
 0x927   : > { %1851 = vperm.xlu1 %3490, %v4210_v56   ;;  %v3519_v57 = vpop.eup %3518 }
 0x928   : > { %v4222_v60 = vpop.eup %3520 }
 0x929   : > { %v4225_v61 = vpop.eup %3522 }
 0x92b   : > { %1854 = vperm.xlu1 %3490, %v4215_v59  }
 0x92f   : > { %1857 = vperm.xlu1 %3490, %v4219_v33  }
 0x933   : > { %1860 = vperm.xlu1 %3490, %v3519_v57  }
 0x937   : > { %1863 = vperm.xlu1 %3490, %v4222_v60  }
 0x93b   : > { %1866 = vperm.xlu1 %3490, %v4225_v61  }
 0x99e   : > { %v1849_v62 = vpop.permute.xlu1 %1848 }
 0x99f   : > { %v1874_v6 = vrot.slane %v1849_v62, %v4065_v45 }
 0x9a0   : > { %v1870_v15 = vpop.permute.xlu0 %1869 }
 0x9a1   : > { %v1902_v21 = vrot.slane %v1870_v15, %v4065_v45 }
 0x9a2   : > { %v1852_v63 = vpop.permute.xlu1 %1851 }
 0x9a3   : > { %v1878_v4 = vrot.slane %v1852_v63, %v4065_v45 }
 0x9a5   : > { %v1903_v26 = vsel %vm1069_vm6, %v1878_v4, %v1874_v6 }
 0x9a6   : > { %v1855_v1 = vpop.permute.xlu1 %1854 }
 0x9a7   : > { %v1882_v5 = vrot.slane %v1855_v1, %v4065_v45 }
 0x9a9   : > { %v1904_v29 = vsel %vm1071_vm7, %v1882_v5, %v1903_v26 }
 0x9aa   : > { %v1858_v2 = vpop.permute.xlu1 %1857 }
 0x9ab   : > { %v1886_v7 = vrot.slane %v1858_v2, %v4065_v45 }
 0x9ad   : > { %v1905_v16 = vsel %vm1073_vm8, %v1886_v7, %v1904_v29 }
 0x9ae   : > { %v1861_v3 = vpop.permute.xlu1 %1860 }
 0x9af   : > { %v1890_v10 = vrot.slane %v1861_v3, %v4065_v45 }
 0x9b1   : > { %v1906_v18 = vsel %vm1762_vm0, %v1890_v10, %v1905_v16  ;;  %v4283_v16 = vld [vmem:[%s4500_s14 + $0x8] sm:$0xff] }
 0x9b2   : > { %v1864_v8 = vpop.permute.xlu1 %1863 }
 0x9b3   : > { %v1894_v13 = vrot.slane %v1864_v8, %v4065_v45 }
 0x9b5   : > { %v1907_v23 = vsel %vm1764_vm10, %v1894_v13, %v1906_v18 }
 0x9b6   : > { %v1867_v17 = vpop.permute.xlu1 %1866 }
 0x9b7   : > { %v1898_v19 = vrot.slane %v1867_v17, %v4065_v45 }
 0x9b9   : > { %v1908_v20 = vsel %vm1766_vm12, %v1898_v19, %v1907_v23 }
 0x9ba   : > { %v1909_v24 = vsel %vm1768_vm13, %v1902_v21, %v1908_v20  ;;  %v2133_v20 = vld [vmem:[%s4499_s13 + $0x8] sm:$0xf] }
 0x9bb   : > { %v1911_v25 = vsel %vm760_vm11, %v1909_v24, 0.0  ;;  %v2132_v24 = vld [vmem:[%s4499_s13] sm:$0xff]  ;;  %3345 = vmatpush3.msk.msra.mxu1 %vm648_vm2, %v2133_v20  ;;  %vm2144_vm2 = vcmask 97280  }
 0x9bc   : > { %1912 = vadd.xlane.f32.xlu1 %v1911_v25  ;;  %3346 = vmatprep.subr.mxu1 %v3747_v0 }
 0x9bd   : > { %3347 = vmatpush3.msra.mxu1 %v2132_v24 }
 0x9be   : > { %3358 = vmatprep.subr.mxu1 %v3747_v0 }
 0xa45   : > { %v1913_v28 = vpop.xlane.xlu1 %1912 }
 0xa46   : > { %v1934_v30 = vrot.slane %v1913_v28, %v4097_v44  ;;  %v1918_v31 = vrot.slane %v1913_v28, %v4035_v40  ;;  %v1922_v32 = vrot.slane %v1913_v28, %v4050_v9  ;;  %v1926_v34 = vrot.slane %v1913_v28, %v4054_v12 }
 0xa47   : > { %v1930_v36 = vrot.slane %v1913_v28, %v4060_v22  ;;  %v1938_v39 = vrot.slane %v1913_v28, %v4110_v51  ;;  %v1942_v9 = vrot.slane %v1913_v28, %v4175_v27  ;;  %v1946_v22 = vrot.slane %v1913_v28, %v4166_v14  ;;  %v4314_v28 = vld [vmem:[%s4502_s16] sm:$0x1] }
 0xa48   : > { %3524 = vrcp.f32 %v1934_v30 }
 0xa49   : > { %3526 = vrcp.f32 %v1918_v31 }
 0xa4a   : > { %3528 = vrcp.f32 %v1922_v32 }
 0xa4b   : > { %3530 = vrcp.f32 %v1926_v34 }
 0xa4c   : > { %3532 = vpow2.f32 %v3228_v37 }
 0xa4d   : > { %3534 = vrcp.f32 %v1930_v36  ;;  %v3237_v36 = vld [vmem:[%s4501_s15] ss:$0 sm:$0xff] }
 0xa4e   : > { %3536 = vrcp.f32 %v1938_v39 }
 0xa4f   : > { %3538 = vrcp.f32 %v1942_v9 }
 0xa50   : > { %3540 = vrcp.f32 %v1946_v22 }
 0xa55   : > { %v3525_v41 = vpop.eup %3524 }
 0xa56   : > { %v3527_v44 = vpop.eup %3526  ;;  %v1964_v46 = vmul.f32 %v3525_v41, %v3519_v57 }
 0xa57   : > { %v1956_v40 = vmul.f32 %v3527_v44, %v4207_v54  ;;  %v3529_v35 = vpop.eup %3528 }
 0xa58   : > { %1992 = vperm.xlu1 %3490, %v1964_v46   ;;  %v1958_v12 = vmul.f32 %v3529_v35, %v4210_v56  ;;  %v3531_v11 = vpop.eup %3530 }
 0xa59   : > { %1980 = vperm.xlu0 %3491, %v1956_v40   ;;  %v3533_v43 = vpop.eup %3532  ;;  %v1960_v51 = vmul.f32 %v3531_v11, %v4215_v59 }
 0xa5a   : > { %v3535_v50 = vpop.eup %3534  ;;  %v1294_v52 = vadd.f32 1.0, %v3533_v43 }
 0xa5b   : > { %v1962_v38 = vmul.f32 %v3535_v50, %v4219_v33  ;;  %v3537_v27 = vpop.eup %3536 }
 0xa5c   : > { %3542 = vrcp.f32 %v1294_v52  ;;  %v1966_v42 = vmul.f32 %v3537_v27, %v4222_v60  ;;  %v3539_v53 = vpop.eup %3538 }
 0xa5d   : > { %1983 = vperm.xlu0 %3491, %v1958_v12   ;;  %v1968_v14 = vmul.f32 %v3539_v53, %v4225_v61  ;;  %v3541_v47 = vpop.eup %3540 }
 0xa5e   : > { %v1970_v54 = vmul.f32 %v3541_v47, %v4213_v49 }
 0xa61   : > { %1986 = vperm.xlu0 %3491, %v1960_v51  }
 0xa65   : > { %1989 = vperm.xlu0 %3491, %v1962_v38  }
 0xa69   : > { %1995 = vperm.xlu0 %3491, %v1966_v42   ;;  %v3543_v55 = vpop.eup %3542 }
 0xa6d   : > { %1998 = vperm.xlu0 %3491, %v1968_v14  }
 0xa71   : > { %2001 = vperm.xlu0 %3491, %v1970_v54  }
 0xa75   : > { %2122 = vrot.lane.b32.xlu0 %v3543_v55, %s3749_s2  ;;  %s3757_s2 = smov 96  }
 0xad3   : > { %v1993_v63 = vpop.permute.xlu1 %1992 }
 0xad4   : > { %v1981_v48 = vpop.permute.xlu0 %1980  ;;  %v2022_v5 = vrot.slane %v1993_v63, %v4065_v45 }
 0xad5   : > { %v2006_v62 = vrot.slane %v1981_v48, %v4065_v45 }
 0xad8   : > { %v1984_v56 = vpop.permute.xlu0 %1983 }
 0xad9   : > { %v2010_v33 = vrot.slane %v1984_v56, %v4065_v45 }
 0xadb   : > { %v2035_v49 = vsel %vm1069_vm6, %v2010_v33, %v2006_v62  ;;  %vm2877_vm6 = vcmask 128005  }
 0xadc   : > { %v1987_v58 = vpop.permute.xlu0 %1986 }
 0xadd   : > { %v2014_v57 = vrot.slane %v1987_v58, %v4065_v45 }
 0xadf   : > { %v2036_v1 = vsel %vm1071_vm7, %v2014_v57, %v2035_v49  ;;  %vm2544_vm7 = vcmask 124930  }
 0xae0   : > { %v1990_v59 = vpop.permute.xlu0 %1989 }
 0xae1   : > { %v2018_v61 = vrot.slane %v1990_v59, %v4065_v45 }
 0xae3   : > { %v2037_v3 = vsel %vm1073_vm8, %v2018_v61, %v2036_v1  ;;  %vm2766_vm8 = vcmask 126980  }
 0xae4   : > { %v1996_v60 = vpop.permute.xlu0 %1995  ;;  %v2038_v7 = vsel %vm1762_vm0, %v2022_v5, %v2037_v3 }
 0xae5   : > { %v2026_v4 = vrot.slane %v1996_v60, %v4065_v45 }
 0xae7   : > { %v2039_v10 = vsel %vm1764_vm10, %v2026_v4, %v2038_v7 }
 0xae8   : > { %v1999_v2 = vpop.permute.xlu0 %1998 }
 0xae9   : > { %v2030_v6 = vrot.slane %v1999_v2, %v4065_v45 }
 0xaeb   : > { %v2040_v13 = vsel %vm1766_vm12, %v2030_v6, %v2039_v10 }
 0xaec   : > { %v2002_v8 = vpop.permute.xlu0 %2001 }
 0xaed   : > { %v2034_v26 = vrot.slane %v2002_v8, %v4065_v45  ;;  %v4288_v45 = vld [vmem:[%s4500_s14] sm:$0xff] }
 0xaef   : > { %v2041_v15 = vsel %vm1768_vm13, %v2034_v26, %v2040_v13 }
 0xaf0   : > { %3342 = vmatmul.mubr.msk.f32.vlgmr.msra.gmra.mxu0 %vm760_vm11, %v2041_v15  ;;  %v2123_v29 = vpop.permute.xlu0 %2122  ;;  %vm2655_vm11 = vcmask 125955  }
 0xaf1   : > { %2125 = vst.msk [vmem:[#allocation4] sm:$0xff] %vm595_vm4, %v2123_v29  ;;  %3355 = vmatprep.mubr.msk.f32.mxu0 %vm3748_vm3, %v3747_v0  ;;  %3352 = vmatpush3.msra.mxu0 %v4283_v16  ;;  %vm2325_vm4 = vcmask 122880  }
 0xaf2   : > { %3353 = vmatprep.subr.mxu0 %v3747_v0 }
 0xaf3   : > { %3354 = vmatpush3.msra.mxu0 %v4288_v45 }
 0xaf4   : > { %3356 = vmatmul.mubr.f32.vlgmr.msra.gmra.mxu0 %v3747_v0  ;;  %3365 = vmatprep.subr.mxu0 %v3747_v0 }
 0xaf5   : > { %3366 = vmatpush3.msra.mxu0 %v4283_v16  ;;  %3369 = vmatprep.mubr.msk.f32.mxu0 %vm3748_vm3, %v3747_v0 }
 0xaf6   : > { %3367 = vmatprep.subr.mxu0 %v3747_v0 }
 0xaf7   : > { %3368 = vmatpush3.msra.mxu0 %v4288_v45 }
 0xaf8   : > { %3379 = vmatprep.subr.mxu0 %v3747_v0 }
 0xbb0   : > { %v2110_v17 = vpop.f32.mrf.mxu0 }
 0xbb1   : > { %v3236_v18 = vmul.f32 -1.442695, %v2110_v17 }
 0xbb2   : > { %v3343_v19 = vpop.f32.mrf.mxu0 }
 0xbb3   : > { %3544 = vpow2.f32 %v3236_v18 }
 0xbb4   : > { %v2291_v30 = vpop.f32.mrf.mxu0 }
 0xbb5   : > { %v2292_v31 = vadd.f32 %v2291_v30, %v4314_v28 }
 0xbb6   : > { %v3357_v32 = vpop.f32.mrf.mxu0 }
 0xbb7   : > { %2303 = vrot.lane.b32.xlu0 %v2292_v31, %s3757_s2 }
 0xbc0   : > { %v3545_v21 = vpop.eup %3544 }
 0xbc1   : > { %v2117_v23 = vadd.f32 1.0, %v3545_v21 }
 0xbc3   : > { %3546 = vrcp.f32 %v2117_v23 }
 0xbd0   : > { %v3547_v25 = vpop.eup %3546 }
 0xbd1   : > { %2127 = vrot.lane.b32.xlu1 %v3547_v25, %s3751_s22  ;;  %s4450_s22 = scalar_lea.hbm %s4503_s17, %s3256_s30 }
 0xc29   : > { %v2304_v12 = vpop.permute.xlu0 %2303 }
 0xc43   : > { %v2128_v34 = vpop.permute.xlu1 %2127 }
 0xc44   : > { %2130 = vst.msk [vmem:[#allocation4] sm:$0xff] %vm602_vm5, %v2128_v34  ;;  %vm2221_vm5 = vcmask 130048  }
 0xc4b   : > { %v2131_v37 = vld [vmem:[#allocation4] sm:$0xff] }
 0xc4c   : > { %3349 = vmatmul.mubr.msk.f32.vlgmr.msra.gmra.mxu1 %vm2144_vm2, %v2131_v37 }
 0xc4d   : > { %3359 = vmatpush3.msra.mxu1 %v4283_v16  ;;  %3362 = vmatprep.mubr.msk.f32.mxu1 %vm3748_vm3, %v3747_v0 }
 0xc4e   : > { %3360 = vmatprep.subr.mxu1 %v3747_v0 }
 0xc4f   : > { %3361 = vmatpush3.msra.mxu1 %v4288_v45 }
 0xc50   : > { %3372 = vmatprep.subr.mxu1 %v3747_v0 }
 0xd0c   : > { %v2217_v39 = vpop.f32.mrf.mxu1 }
 0xd0d   : > { %v4328_v41 = vadd.f32 %v3237_v36, %v2217_v39 }
 0xd0e   : > { %v3350_v44 = vpop.f32.mrf.mxu1 }
 0xd0f   : > { %v2295_v46 = vadd.f32 %v2292_v31, %v4328_v41 }
 0xd11   : > { %v3240_v40 = vmul.f32 -1.442695, %v2295_v46 }
 0xd13   : > { %3548 = vpow2.f32 %v3240_v40 }
 0xd20   : > { %v3549_v9 = vpop.eup %3548 }
 0xd21   : > { %v2299_v35 = vadd.f32 1.0, %v3549_v9 }
 0xd23   : > { %3550 = vrcp.f32 %v2299_v35 }
 0xd30   : > { %v3551_v22 = vpop.eup %3550 }
 0xd31   : > { %v2306_v11 = vmul.f32 %v3551_v22, %v2304_v12  ;;  %v2313_v52 = vsub.f32 1.0, %v3551_v22  ;;  %v2319_v27 = vmul.f32 0.0, %v3551_v22 }
 0xd33   : > { %2308 = vrot.lane.b32.xlu1 %v2306_v11, %s3758_s24 }
 0xda5   : > { %v2309_v43 = vpop.permute.xlu1 %2308 }
 0xda6   : > { %v2311_v51 = vadd.f32 %v2309_v43, %v4328_v41 }
 0xda8   : > { %3552 = vtanh.f32 %v2311_v51 }
 0xdb5   : > { %v3553_v50 = vpop.eup %3552 }
 0xdb6   : > { %2315 = vrot.lane.b32.xlu0 %v3553_v50, %s3759_s23 }
 0xe28   : > { %v2316_v38 = vpop.permute.xlu0 %2315 }
 0xe29   : > { %v2318_v42 = vmul.f32 %v2316_v38, %v2313_v52 }
 0xe2b   : > { %v2320_v53 = vadd.f32 %v2319_v27, %v2318_v42 }
 0xe2d   : > { %2322 = vrot.lane.b32.xlu1 %v2320_v53, %s3759_s23  ;;  %v2425_v1 = vrot.slane %v2320_v53, 7 }
 0xe9f   : > { %v2323_v14 = vpop.permute.xlu1 %2322 }
 0xea0   : > { %2326 = vst.msk [vmem:[#allocation5] sm:$0x1] %vm2325_vm4, %v2323_v14  ;;  %3363 = vmatmul.mubr.msk.f32.vlgmr.msra.gmra.mxu1 %vm2221_vm5, %v2323_v14 }
 0xea1   : > { %3373 = vmatpush3.msra.mxu1 %v4283_v16  ;;  %3376 = vmatprep.mubr.msk.f32.mxu1 %vm3748_vm3, %v3747_v0 }
 0xea2   : > { %3374 = vmatprep.subr.mxu1 %v3747_v0 }
 0xea3   : > { %3375 = vmatpush3.msra.mxu1 %v4288_v45 }
 0xea4   : > { %3386 = vmatprep.subr.mxu1 %v3747_v0 }
 0xf60   : > { %v2395_v47 = vpop.f32.mrf.mxu1 }
 0xf61   : > { %v2396_v54 = vadd.f32 %v2395_v47, %v4314_v28 }
 0xf62   : > { %v3364_v55 = vpop.f32.mrf.mxu1 }
 0xf63   : > { %v2400_v48 = vrot.slane %v2396_v54, 7 }
 0xf65   : > { %2409 = vrot.lane.b32.xlu0 %v2400_v48, %s3757_s2  ;;  %v2402_v56 = vadd.f32 %v2400_v48, %v4328_v41 }
 0xf67   : > { %v3242_v58 = vmul.f32 -1.442695, %v2402_v56 }
 0xf69   : > { %3554 = vpow2.f32 %v3242_v58 }
 0xf76   : > { %v3555_v59 = vpop.eup %3554 }
 0xf77   : > { %v2406_v33 = vadd.f32 1.0, %v3555_v59 }
 0xf79   : > { %3556 = vrcp.f32 %v2406_v33 }
 0xf86   : > { %v3557_v57 = vpop.eup %3556 }
 0xf87   : > { %v2419_v2 = vsub.f32 1.0, %v3557_v57  ;;  %v2427_v5 = vmul.f32 %v3557_v57, %v2425_v1 }
 0xfd7   : > { %v2410_v60 = vpop.permute.xlu0 %2409 }
 0xfd8   : > { %v2412_v62 = vmul.f32 %v3557_v57, %v2410_v60 }
 0xfda   : > { %2414 = vrot.lane.b32.xlu1 %v2412_v62, %s3758_s24 }
0x104c   : > { %v2415_v61 = vpop.permute.xlu1 %2414 }
0x104d   : > { %v2417_v63 = vadd.f32 %v2415_v61, %v4328_v41 }
0x104f   : > { %3558 = vtanh.f32 %v2417_v63 }
0x105c   : > { %v3559_v49 = vpop.eup %3558 }
0x105d   : > { %2421 = vrot.lane.b32.xlu0 %v3559_v49, %s3759_s23 }
0x10cf   : > { %v2422_v3 = vpop.permute.xlu0 %2421 }
0x10d0   : > { %v2424_v4 = vmul.f32 %v2422_v3, %v2419_v2 }
0x10d2   : > { %v4348_v6 = vadd.f32 %v2427_v5, %v2424_v4 }
0x10d4   : > { %v2435_v7 = vrot.slane %v4348_v6, 1  ;;  %v2536_v32 = vrot.slane %v4348_v6, 7 }
0x10d6   : > { %2436 = vrot.lane.b32.xlu1 %v2435_v7, %s3759_s23 }
0x1148   : > { %v2437_v8 = vpop.permute.xlu1 %2436 }
0x1149   : > { %3370 = vmatmul.mubr.msk.f32.vlgmr.msra.gmra.mxu0 %vm2221_vm5, %v2437_v8 }
0x114a   : > { %3380 = vmatpush3.msra.mxu0 %v4283_v16  ;;  %3383 = vmatprep.mubr.msk.f32.mxu0 %vm3748_vm3, %v3747_v0 }
0x114b   : > { %3381 = vmatprep.subr.mxu0 %v3747_v0 }
0x114c   : > { %3382 = vmatpush3.msra.mxu0 %v4288_v45 }
0x114d   : > { %3393 = vmatprep.subr.mxu0 %v3747_v0 }
0x1209   : > { %v2506_v10 = vpop.f32.mrf.mxu0 }
0x120a   : > { %v2507_v26 = vadd.f32 %v2506_v10, %v4314_v28 }
0x120b   : > { %v3371_v13 = vpop.f32.mrf.mxu0 }
0x120c   : > { %v2511_v15 = vrot.slane %v2507_v26, 6 }
0x120e   : > { %2520 = vrot.lane.b32.xlu0 %v2511_v15, %s3757_s2  ;;  %v2513_v29 = vadd.f32 %v2511_v15, %v4328_v41 }
0x1210   : > { %v3244_v17 = vmul.f32 -1.442695, %v2513_v29 }
0x1212   : > { %3560 = vpow2.f32 %v3244_v17 }
0x121f   : > { %v3561_v18 = vpop.eup %3560 }
0x1220   : > { %v2517_v19 = vadd.f32 1.0, %v3561_v18 }
0x1222   : > { %3562 = vrcp.f32 %v2517_v19 }
0x122f   : > { %v3563_v21 = vpop.eup %3562 }
0x1230   : > { %v2530_v31 = vsub.f32 1.0, %v3563_v21  ;;  %v2538_v37 = vmul.f32 %v3563_v21, %v2536_v32 }
0x1280   : > { %v2521_v23 = vpop.permute.xlu0 %2520 }
0x1281   : > { %v2523_v20 = vmul.f32 %v3563_v21, %v2521_v23 }
0x1283   : > { %2525 = vrot.lane.b32.xlu1 %v2523_v20, %s3758_s24 }
0x12f5   : > { %v2526_v24 = vpop.permute.xlu1 %2525 }
0x12f6   : > { %v2528_v25 = vadd.f32 %v2526_v24, %v4328_v41 }
0x12f8   : > { %3564 = vtanh.f32 %v2528_v25 }
0x1305   : > { %v3565_v30 = vpop.eup %3564 }
0x1306   : > { %2532 = vrot.lane.b32.xlu0 %v3565_v30, %s3759_s23 }
0x1378   : > { %v2533_v34 = vpop.permute.xlu0 %2532 }
0x1379   : > { %v2535_v36 = vmul.f32 %v2533_v34, %v2530_v31 }
0x137b   : > { %v4366_v39 = vadd.f32 %v2538_v37, %v2535_v36 }
0x137d   : > { %v2546_v44 = vrot.slane %v4366_v39, 2  ;;  %v2647_v47 = vrot.slane %v4366_v39, 7 }
0x137f   : > { %2547 = vrot.lane.b32.xlu1 %v2546_v44, %s3759_s23 }
0x13f1   : > { %v2548_v46 = vpop.permute.xlu1 %2547 }
0x13f2   : > { %3377 = vmatmul.mubr.msk.f32.vlgmr.msra.gmra.mxu1 %vm2221_vm5, %v2548_v46 }
0x13f3   : > { %3387 = vmatpush3.msra.mxu1 %v4283_v16  ;;  %3390 = vmatprep.mubr.msk.f32.mxu1 %vm3748_vm3, %v3747_v0 }
0x13f4   : > { %3388 = vmatprep.subr.mxu1 %v3747_v0 }
0x13f5   : > { %3389 = vmatpush3.msra.mxu1 %v4288_v45 }
0x13f6   : > { %3400 = vmatprep.subr.mxu1 %v3747_v0 }
0x14b2   : > { %v2617_v40 = vpop.f32.mrf.mxu1 }
0x14b3   : > { %v2618_v9 = vadd.f32 %v2617_v40, %v4314_v28 }
0x14b4   : > { %v3378_v35 = vpop.f32.mrf.mxu1 }
0x14b5   : > { %v2622_v12 = vrot.slane %v2618_v9, 5 }
0x14b7   : > { %2631 = vrot.lane.b32.xlu0 %v2622_v12, %s3757_s2  ;;  %v2624_v22 = vadd.f32 %v2622_v12, %v4328_v41 }
0x14b9   : > { %v3246_v11 = vmul.f32 -1.442695, %v2624_v22 }
0x14bb   : > { %3566 = vpow2.f32 %v3246_v11 }
0x14c8   : > { %v3567_v43 = vpop.eup %3566 }
0x14c9   : > { %v2628_v51 = vadd.f32 1.0, %v3567_v43 }
0x14cb   : > { %3568 = vrcp.f32 %v2628_v51 }
0x14d8   : > { %v3569_v50 = vpop.eup %3568 }
0x14d9   : > { %v2641_v14 = vsub.f32 1.0, %v3569_v50  ;;  %v2649_v55 = vmul.f32 %v3569_v50, %v2647_v47 }
0x1529   : > { %v2632_v52 = vpop.permute.xlu0 %2631 }
0x152a   : > { %v2634_v38 = vmul.f32 %v3569_v50, %v2632_v52 }
0x152c   : > { %2636 = vrot.lane.b32.xlu1 %v2634_v38, %s3758_s24 }
0x159e   : > { %v2637_v27 = vpop.permute.xlu1 %2636 }
0x159f   : > { %v2639_v42 = vadd.f32 %v2637_v27, %v4328_v41 }
0x15a1   : > { %3570 = vtanh.f32 %v2639_v42 }
0x15ae   : > { %v3571_v53 = vpop.eup %3570 }
0x15af   : > { %2643 = vrot.lane.b32.xlu0 %v3571_v53, %s3759_s23 }
0x1621   : > { %v2644_v54 = vpop.permute.xlu0 %2643 }
0x1622   : > { %v2646_v48 = vmul.f32 %v2644_v54, %v2641_v14 }
0x1624   : > { %v4384_v56 = vadd.f32 %v2649_v55, %v2646_v48 }
0x1626   : > { %v2657_v58 = vrot.slane %v4384_v56, 3  ;;  %v2758_v26 = vrot.slane %v4384_v56, 7 }
0x1628   : > { %2658 = vrot.lane.b32.xlu1 %v2657_v58, %s3759_s23 }
0x169a   : > { %v2659_v59 = vpop.permute.xlu1 %2658 }
0x169b   : > { %3384 = vmatmul.mubr.msk.f32.vlgmr.msra.gmra.mxu0 %vm2221_vm5, %v2659_v59 }
0x169c   : > { %3394 = vmatpush3.msra.mxu0 %v4283_v16  ;;  %3397 = vmatprep.mubr.msk.f32.mxu0 %vm3748_vm3, %v3747_v0 }
0x169d   : > { %3395 = vmatprep.subr.mxu0 %v3747_v0 }
0x169e   : > { %3396 = vmatpush3.msra.mxu0 %v4288_v45 }
0x175b   : > { %v2728_v33 = vpop.f32.mrf.mxu0 }
0x175c   : > { %v2729_v57 = vadd.f32 %v2728_v33, %v4314_v28 }
0x175d   : > { %v3385_v60 = vpop.f32.mrf.mxu0 }
0x175e   : > { %v2733_v62 = vrot.slane %v2729_v57, 4 }
0x1760   : > { %2742 = vrot.lane.b32.xlu0 %v2733_v62, %s3757_s2  ;;  %v2735_v61 = vadd.f32 %v2733_v62, %v4328_v41 }
0x1762   : > { %v3248_v63 = vmul.f32 -1.442695, %v2735_v61 }
0x1764   : > { %3572 = vpow2.f32 %v3248_v63 }
0x1771   : > { %v3573_v49 = vpop.eup %3572 }
0x1772   : > { %v2739_v1 = vadd.f32 1.0, %v3573_v49 }
0x1774   : > { %3574 = vrcp.f32 %v2739_v1 }
0x1781   : > { %v3575_v2 = vpop.eup %3574 }
0x1782   : > { %v2752_v10 = vsub.f32 1.0, %v3575_v2  ;;  %v2760_v15 = vmul.f32 %v3575_v2, %v2758_v26 }
0x17d2   : > { %v2743_v3 = vpop.permute.xlu0 %2742 }
0x17d3   : > { %v2745_v4 = vmul.f32 %v3575_v2, %v2743_v3 }
0x17d5   : > { %2747 = vrot.lane.b32.xlu1 %v2745_v4, %s3758_s24 }
0x1847   : > { %v2748_v5 = vpop.permute.xlu1 %2747 }
0x1848   : > { %v2750_v7 = vadd.f32 %v2748_v5, %v4328_v41 }
0x184a   : > { %3576 = vtanh.f32 %v2750_v7 }
0x1857   : > { %v3577_v8 = vpop.eup %3576 }
0x1858   : > { %2754 = vrot.lane.b32.xlu0 %v3577_v8, %s3759_s23 }
0x18ca   : > { %v2755_v13 = vpop.permute.xlu0 %2754 }
0x18cb   : > { %v2757_v29 = vmul.f32 %v2755_v13, %v2752_v10 }
0x18cd   : > { %v4401_v17 = vadd.f32 %v2760_v15, %v2757_v29 }
0x18cf   : > { %v2768_v18 = vrot.slane %v4401_v17, 4  ;;  %v2869_v46 = vrot.slane %v4401_v17, 7 }
0x18d1   : > { %2769 = vrot.lane.b32.xlu1 %v2768_v18, %s3759_s23 }
0x1943   : > { %v2770_v19 = vpop.permute.xlu1 %2769 }
0x1944   : > { %3391 = vmatmul.mubr.msk.f32.vlgmr.msra.gmra.mxu1 %vm2221_vm5, %v2770_v19 }
0x1945   : > { %3401 = vmatpush3.msra.mxu1 %v4283_v16  ;;  %3404 = vmatprep.mubr.msk.f32.mxu1 %vm3748_vm3, %v3747_v0  ;;  %vm2433_vm3 = vcmask 123905  }
0x1946   : > { %3402 = vmatprep.subr.mxu1 %v3747_v0 }
0x1947   : > { %3403 = vmatpush3.msra.mxu1 %v4288_v45 }
0x1a04   : > { %v2839_v21 = vpop.f32.mrf.mxu1 }
0x1a05   : > { %v2840_v23 = vadd.f32 %v2839_v21, %v4314_v28 }
0x1a06   : > { %v3392_v20 = vpop.f32.mrf.mxu1 }
0x1a07   : > { %v2844_v24 = vrot.slane %v2840_v23, 3 }
0x1a09   : > { %2853 = vrot.lane.b32.xlu0 %v2844_v24, %s3757_s2  ;;  %v2846_v25 = vadd.f32 %v2844_v24, %v4328_v41 }
0x1a0b   : > { %v3250_v30 = vmul.f32 -1.442695, %v2846_v25 }
0x1a0d   : > { %3578 = vpow2.f32 %v3250_v30 }
0x1a1a   : > { %v3579_v31 = vpop.eup %3578 }
0x1a1b   : > { %v2850_v16 = vadd.f32 1.0, %v3579_v31 }
0x1a1d   : > { %3580 = vrcp.f32 %v2850_v16 }
0x1a2a   : > { %v3581_v32 = vpop.eup %3580 }
0x1a2b   : > { %v2863_v44 = vsub.f32 1.0, %v3581_v32  ;;  %v2871_v9 = vmul.f32 %v3581_v32, %v2869_v46 }
0x1a7b   : > { %v2854_v34 = vpop.permute.xlu0 %2853 }
0x1a7c   : > { %v2856_v37 = vmul.f32 %v3581_v32, %v2854_v34 }
0x1a7e   : > { %2858 = vrot.lane.b32.xlu1 %v2856_v37, %s3758_s24 }
0x1af0   : > { %v2859_v0 = vpop.permute.xlu1 %2858 }
0x1af1   : > { %v2861_v45 = vadd.f32 %v2859_v0, %v4328_v41 }
0x1af3   : > { %3582 = vtanh.f32 %v2861_v45 }
0x1b00   : > { %v3583_v36 = vpop.eup %3582 }
0x1b01   : > { %2865 = vrot.lane.b32.xlu0 %v3583_v36, %s3759_s23 }
0x1b73   : > { %v2866_v40 = vpop.permute.xlu0 %2865 }
0x1b74   : > { %v2868_v35 = vmul.f32 %v2866_v40, %v2863_v44 }
0x1b76   : > { %v2872_v12 = vadd.f32 %v2871_v9, %v2868_v35 }
0x1b78   : > { %v2879_v22 = vrot.slane %v2872_v12, 5  ;;  %v2980_v33 = vrot.slane %v2872_v12, 7 }
0x1b7a   : > { %2880 = vrot.lane.b32.xlu1 %v2879_v22, %s3759_s23 }
0x1bec   : > { %v2881_v11 = vpop.permute.xlu1 %2880 }
0x1bed   : > { %3398 = vmatmul.mubr.msk.f32.vlgmr.msra.gmra.mxu0 %vm2221_vm5, %v2881_v11 }
0x1cad   : > { %v2950_v43 = vpop.f32.mrf.mxu0 }
0x1cae   : > { %v2951_v51 = vadd.f32 %v2950_v43, %v4314_v28 }
0x1caf   : > { %v3399_v50 = vpop.f32.mrf.mxu0 }
0x1cb0   : > { %v2955_v52 = vrot.slane %v2951_v51, 2 }
0x1cb2   : > { %2964 = vrot.lane.b32.xlu0 %v2955_v52, %s3757_s2  ;;  %v2957_v38 = vadd.f32 %v2955_v52, %v4328_v41 }
0x1cb4   : > { %v3252_v27 = vmul.f32 -1.442695, %v2957_v38 }
0x1cb6   : > { %3584 = vpow2.f32 %v3252_v27 }
0x1cc3   : > { %v3585_v42 = vpop.eup %3584 }
0x1cc4   : > { %v2961_v53 = vadd.f32 1.0, %v3585_v42 }
0x1cc6   : > { %3586 = vrcp.f32 %v2961_v53 }
0x1cd3   : > { %v3587_v14 = vpop.eup %3586 }
0x1cd4   : > { %v2974_v59 = vsub.f32 1.0, %v3587_v14  ;;  %v2982_v60 = vmul.f32 %v3587_v14, %v2980_v33 }
0x1d24   : > { %v2965_v47 = vpop.permute.xlu0 %2964 }
0x1d25   : > { %v2967_v54 = vmul.f32 %v3587_v14, %v2965_v47 }
0x1d27   : > { %2969 = vrot.lane.b32.xlu1 %v2967_v54, %s3758_s24 }
0x1d99   : > { %v2970_v55 = vpop.permute.xlu1 %2969 }
0x1d9a   : > { %v2972_v48 = vadd.f32 %v2970_v55, %v4328_v41 }
0x1d9c   : > { %3588 = vtanh.f32 %v2972_v48 }
0x1da9   : > { %v3589_v58 = vpop.eup %3588 }
0x1daa   : > { %2976 = vrot.lane.b32.xlu0 %v3589_v58, %s3759_s23 }
0x1e1c   : > { %v2977_v57 = vpop.permute.xlu0 %2976 }
0x1e1d   : > { %v2979_v62 = vmul.f32 %v2977_v57, %v2974_v59 }
0x1e1f   : > { %v2983_v61 = vadd.f32 %v2982_v60, %v2979_v62 }
0x1e21   : > { %v2990_v63 = vrot.slane %v2983_v61, 6 }
0x1e23   : > { %2991 = vrot.lane.b32.xlu1 %v2990_v63, %s3759_s23 }
0x1e95   : > { %v2992_v49 = vpop.permute.xlu1 %2991 }
0x1e96   : > { %3405 = vmatmul.mubr.msk.f32.vlgmr.msra.gmra.mxu1 %vm2221_vm5, %v2992_v49 }
0x1f56   : > { %v3061_v1 = vpop.f32.mrf.mxu1 }
0x1f57   : > { %v3062_v2 = vadd.f32 %v3061_v1, %v4314_v28 }
0x1f58   : > { %v3406_v3 = vpop.f32.mrf.mxu1 }
0x1f59   : > { %v3066_v4 = vrot.slane %v3062_v2, 1 }
0x1f5b   : > { %3075 = vrot.lane.b32.xlu0 %v3066_v4, %s3757_s2  ;;  %v3068_v5 = vadd.f32 %v3066_v4, %v4328_v41 }
0x1f5d   : > { %v3254_v7 = vmul.f32 -1.442695, %v3068_v5 }
0x1f5f   : > { %3590 = vpow2.f32 %v3254_v7 }
0x1f6c   : > { %v3591_v8 = vpop.eup %3590 }
0x1f6d   : > { %v3072_v10 = vadd.f32 1.0, %v3591_v8 }
0x1f6f   : > { %3592 = vrcp.f32 %v3072_v10 }
0x1f7c   : > { %v3593_v26 = vpop.eup %3592 }
0x1fcd   : > { %v3076_v13 = vpop.permute.xlu0 %3075 }
0x1fce   : > { %v3078_v15 = vmul.f32 %v3593_v26, %v3076_v13 }
0x1fd0   : > { %3080 = vrot.lane.b32.xlu1 %v3078_v15, %s3758_s24  ;;  %s3674_s24 = scalar_lea.vmem %s3118_s19, 128 }
0x1fd1   : > { %p3675_p10 = scmp.ne.s32.totalorder %s3118_s19, %s3674_s24 }
0x1fd3   : > { %p3676_p2 = pnand %p3675_p10, %p4534_p12 }
0x1fd4   : > { %2430 = vrot.lane.b32.xlu1 %v4348_v6, %s3759_s23  ;;  %v3091_v6 = vrot.slane %v2983_v61, 7 }
0x1fd5   : > { %p3677_p9 = pneg %p3676_p2 }
0x1fd6   : > { %v3093_v20 = vmul.f32 %v3593_v26, %v3091_v6 }
0x1fd8   : > { %2652 = vrot.lane.b32.xlu1 %v4384_v56, %s3759_s23 }
0x1fdc   : > { %2874 = vrot.lane.b32.xlu1 %v2872_v12, %s3759_s23 }
0x2042   : > { %v3081_v28 = vpop.permute.xlu1 %3080 }
0x2043   : > { %v3083_v29 = vadd.f32 %v3081_v28, %v4328_v41  ;;  %v3085_v41 = vsub.f32 1.0, %v3593_v26 }
0x2045   : > { %3594 = vtanh.f32 %v3083_v29 }
0x2046   : > { %v2431_v18 = vpop.permute.xlu1 %2430 }
0x2047   : > { %2434 = vst.msk [vmem:[#allocation5] sm:$0x2] %vm2433_vm3, %v2431_v18 }
0x204a   : > { %v2653_v19 = vpop.permute.xlu1 %2652 }
0x204b   : > { %2656 = vst.msk [vmem:[#allocation5] sm:$0x8] %vm2655_vm11, %v2653_v19 }
0x204e   : > { %v2875_v21 = vpop.permute.xlu1 %2874 }
0x204f   : > { %2878 = vst.msk [vmem:[#allocation5] sm:$0x20] %vm2877_vm6, %v2875_v21 }
0x2052   : > { %v3595_v23 = vpop.eup %3594 }
0x2053   : > { %3087 = vrot.lane.b32.xlu0 %v3595_v23, %s3759_s23 }
0x2057   : > { %2541 = vrot.lane.b32.xlu0 %v4366_v39, %s3759_s23 }
0x205b   : > { %2763 = vrot.lane.b32.xlu0 %v4401_v17, %s3759_s23 }
0x205f   : > { %2985 = vrot.lane.b32.xlu0 %v2983_v61, %s3759_s23 }
0x20c5   : > { %v3088_v56 = vpop.permute.xlu0 %3087 }
0x20c6   : > { %v3090_v24 = vmul.f32 %v3088_v56, %v3085_v41 }
0x20c8   : > { %v3094_v25 = vadd.f32 %v3093_v20, %v3090_v24 }
0x20c9   : > { %v2542_v30 = vpop.permute.xlu0 %2541 }
0x20ca   : > { %2545 = vst.msk [vmem:[#allocation5] sm:$0x4] %vm2544_vm7, %v2542_v30  ;;  %3096 = vrot.lane.b32.xlu1 %v3094_v25, %s3759_s23  ;;  %s3760_s23 = smov [#allocation12]  }
0x20cb   : > { %s3678_s3 = sshll.u32 %s3760_s23, 4  ;;  %s3679_s3 = int_to_ptr.vmem [resolvable:$false] %s3678_s3 }
0x20cc   : > { %s3680_s28 = scalar_lea.vmem %s3679_s3, 256  ;;  %p3681_p4 = scmp.lt.s32.totalorder %s3118_s19, %s3679_s3 }
0x20cd   : > { %v2764_v39 = vpop.permute.xlu0 %2763  ;;  %p3682_p5 = scmp.lt.s32.totalorder %s3680_s28, %s3674_s24 }
0x20ce   : > { %2767 = vst.msk [vmem:[#allocation5] sm:$0x10] %vm2766_vm8, %v2764_v39 }
0x20cf   : > { %p3683_p6 = por %p3682_p5, %p3681_p4 }
0x20d1   : > { %v2986_v17 = vpop.permute.xlu0 %2985  ;;  %p3684_p7 = pnand %p3683_p6, %p3677_p9 }
0x20d2   : > { %2989 = vst.msk [vmem:[#allocation5] sm:$0x40] %vm2988_vm14, %v2986_v17 }
0x213c   : > { %v3097_v31 = vpop.permute.xlu1 %3096 }
0x213d   : > { %3100 = vst.msk [vmem:[#allocation5] sm:$0x80] %vm3099_vm15, %v3097_v31 }
0x2144   : > { %v3101_v16 = vld [vmem:[#allocation5] sm:$0xff] }
0x2145   : > { %3102 = vst.msk [vmem:[%s577_s18] sm:$0xff] %vm2221_vm5, %v3101_v16 }
0x2146   : > { %3687 = shalt.err (!%p3684_p7)
}
0x2147   : > { %s3688_s21 = scalar_lea.hbm %s4450_s22, 128  ;;  %s3692_s18 = scalar_lea.hbm %s4503_s17, 256 }
0x2148   : > { %p3689_p8 = scmp.ne.s32.totalorder %s4450_s22, %s3688_s21  ;;  %p3693_p0 = scmp.lt.s32.totalorder %s4450_s22, %s4503_s17 }
0x2149   : > { %p3694_p1 = scmp.lt.s32.totalorder %s3692_s18, %s3688_s21 }
0x214a   : > { %p3690_p13 = pnand %p3689_p8, %p4534_p12 }
0x214b   : > { %p3695_p3 = por %p3694_p1, %p3693_p0 }
0x214c   : > { %p3691_p11 = pneg %p3690_p13 }
0x214e   : > { %p3696_p10 = pnand %p3695_p3, %p3691_p11 }
0x2150   : > { %3699 = shalt.err (!%p3696_p10)
}
0x2151   : > { %3419 = dma.vmem_to_hbm [thread:$0]  (%p4534_p12), %s3118_s19, 128, %s4450_s22, %s3104_s0  }
0x2152 PF: > { %s4535_s3 = sld [smem:[#allocation16_spill]]  ;;  %p3441_p2 = scmp.ge.s32.totalorder %s3742_s27, 2 }
0x2153   : > { %s4536_s24 = sld [smem:[#allocation20_spill]] }
0x2158   : > { %s3129_s23 = sand.u32 1, %s4535_s3  }
0x2159   : > { %p4537_p9 = scmp.ne.s32.totalorder %s4536_s24, 0  ;;  %s3130_s28 = scalar_lea.sflag [#allocation8], %s3129_s23 }
0x215b   : > { %p3432_p4 = pnand %p3441_p2, %p4537_p9 }
0x215d   : > { %p3433_p5 = pneg %p3432_p4 }
0x215f   : > { %3725 = dma.done.wait (%p3433_p5), %s3130_s28, 128  }
0x2160   : > { %3727 = vsyncadd (%p3433_p5), %s3130_s28, 4294967168  ;;  %s4538_s27 = sld [smem:[#allocation18_spill]]  ;;  %s4541_s24 = smov %s3734_s25 }
0x2161   : > { %s4539_s21 = sld [smem:[#allocation17_spill]] }
0x2162   : > { %s4540_s26 = sld [smem:[#allocation19_spill]] }
0x2166   : > { %p29_p6 = scmp.ge.s32.totalorder %s4538_s27, 4  }
0x2167   : > { %s4542_s25 = smov %s4539_s21 }
0x2168   :  { %31 = sbr.rel (!%p29_p6) target bundleno = 10 (0xa), region = 136 }
0x216d   :  { %3135 = vsyncpa [#allocation7], 1 }
0x216e   :  { %3137 = vsyncpa [#allocation7 + $0x1], 1 }
0x216f   :  { %3138 = vsyncpa [#allocation10], 1 }
0x2170   :  { %3139 = vsyncpa [#allocation8], 1 }
0x2171   :  { %3141 = vsyncpa [#allocation8 + $0x1], 1 }

</bundles_post_ra>
